<compile_context>
chip_gen: v6e
topology: v6e:2x2x1
jax: 0.10.0
libtpu: 0.0.40
codegen_flags: <defaults>
</compile_context>

<pallas_src>
import math

import jax
import jax.numpy as jnp
from jax.experimental import pallas as pl
from jax.experimental.pallas import tpu as pltpu

MIN_LANES = 128
VMEM_LIMIT = 48 * 1024 * 1024  # safe on v5e/v6e (128 MiB) and v7x (64 MiB)


# ----------------------------- tiled matmul --------------------------------

def matmul_kernel(x_ref, w_ref, o_ref, acc_ref):
    # x: (tm, tk) bf16, w: (tk, tn) bf16, acc: (tm, tn) f32 resident across k.
    @pl.when(pl.program_id(2) == 0)
    def _():
        acc_ref[...] = jnp.zeros_like(acc_ref)

    acc_ref[...] += jnp.dot(
        x_ref[...], w_ref[...], preferred_element_type=jnp.float32
    )

    @pl.when(pl.program_id(2) == pl.num_programs(2) - 1)
    def _():
        o_ref[...] = acc_ref[...].astype(o_ref.dtype)


def _pick_tile(dim, target, align=128):
    """Largest `align`-aligned tile <= target that divides dim (or dim itself)."""
    if dim <= target:
        return dim
    t = (target // align) * align
    while t >= align:
        if dim % t == 0:
            return t
        t -= align
    raise AssertionError(f"no {align}-aligned tile <= {target} divides {dim}")


def linear(x, w_t, out_dtype=None, *, tm=256, tn=512, tk=512):
    """y = x @ w_t  with x:(M,K) bf16, w_t:(K,N) bf16 (weight pre-transposed)."""
    M, K = x.shape
    K2, N = w_t.shape
    assert K == K2
    out_dtype = out_dtype or x.dtype
    tm, tn, tk = _pick_tile(M, tm), _pick_tile(N, tn), _pick_tile(K, tk)
    assert M % tm == 0 and N % tn == 0 and K % tk == 0, (M, N, K, tm, tn, tk)
    return pl.pallas_call(
        matmul_kernel,
        out_shape=jax.ShapeDtypeStruct((M, N), out_dtype),
        grid_spec=pltpu.PrefetchScalarGridSpec(
            num_scalar_prefetch=0,
            grid=(M // tm, N // tn, K // tk),
            in_specs=[
                pl.BlockSpec((tm, tk), lambda i, j, k: (i, k)),
                pl.BlockSpec((tk, tn), lambda i, j, k: (k, j)),
            ],
            out_specs=pl.BlockSpec((tm, tn), lambda i, j, k: (i, j)),
            scratch_shapes=[pltpu.VMEM((tm, tn), jnp.float32)],
        ),
        compiler_params=pltpu.CompilerParams(
            dimension_semantics=("parallel", "parallel", "arbitrary"),
            vmem_limit_bytes=VMEM_LIMIT,
        ),
    )(x, w_t)


# ------------------------ flash attention (GQA) -----------------------------
# Grid (B, Hkv, T//tkv); all n_rep query heads sharing a KV head are stacked
# along the row dim of the q/o block (Mq = n_rep * S), so K/V tiles are read
# once per KV head.  1/sqrt(D) is already folded into wq.

def flash_attn_kernel(q_ref, k_ref, v_ref, o_ref, m_ref, l_ref, acc_ref):
    # q: (1,1,Mq,D) bf16   k,v: (1,1,tkv,D) bf16   o: (1,1,Mq,D)
    # m,l: (Mq,128) f32 (lane-replicated)  acc: (Mq,D) f32 -- resident across KV.
    kv_step = pl.program_id(2)

    @pl.when(kv_step == 0)
    def _():
        m_ref[...] = jnp.full_like(m_ref, -jnp.inf)
        l_ref[...] = jnp.zeros_like(l_ref)
        acc_ref[...] = jnp.zeros_like(acc_ref)

    q = q_ref[0, 0]                      # (Mq, D) bf16, scale pre-folded into wq
    k = k_ref[0, 0]                      # (tkv, D)
    v = v_ref[0, 0]

    # scores without transposing k (contract last dims of both) -> (Mq, tkv) f32
    s = jax.lax.dot_general(
        q, k, (((1,), (1,)), ((), ())), preferred_element_type=jnp.float32
    )

    m_prev = m_ref[...]                                     # (Mq, 128) replicated
    m_cur = jnp.max(s, axis=-1, keepdims=True)              # (Mq, 1)
    m_new = jnp.maximum(m_prev, m_cur)                      # (Mq, 128) replicated
    alpha = jnp.exp(m_prev - m_new)                         # f32 softmax (v5e-safe)
    p = jnp.exp(s - m_new[:, 0:1])                          # (Mq, tkv)
    l_ref[...] = alpha * l_ref[...] + jnp.sum(p, axis=-1, keepdims=True)
    acc_ref[...] = alpha[:, 0:1] * acc_ref[...] + jnp.dot(
        p.astype(v.dtype), v, preferred_element_type=jnp.float32
    )
    m_ref[...] = m_new

    @pl.when(kv_step == pl.num_programs(2) - 1)
    def _():
        inv_l = pl.reciprocal(l_ref[...][:, 0:1], approx=True)   # EUP, not VPU divide
        o_ref[0, 0] = (acc_ref[...] * inv_l).astype(o_ref.dtype)


def flash_attention(q_grouped, k, v, *, tkv=256):
    """q_grouped: (B, Hkv, Mq, D) with Mq = n_rep*S (query heads sharing a KV
    head stacked along rows).  k, v: (B, Hkv, T, D) un-repeated.  Softmax over
    all T positions (no mask, exactly like the reference module)."""
    B, Hkv, Mq, D = q_grouped.shape
    _, _, T, _ = k.shape
    tkv = min(tkv, T)
    assert T % tkv == 0
    return pl.pallas_call(
        flash_attn_kernel,
        out_shape=jax.ShapeDtypeStruct((B, Hkv, Mq, D), q_grouped.dtype),
        grid_spec=pltpu.PrefetchScalarGridSpec(
            num_scalar_prefetch=0,
            grid=(B, Hkv, T // tkv),
            in_specs=[
                pl.BlockSpec((1, 1, Mq, D), lambda b, g, j: (b, g, 0, 0)),
                pl.BlockSpec((1, 1, tkv, D), lambda b, g, j: (b, g, j, 0)),
                pl.BlockSpec((1, 1, tkv, D), lambda b, g, j: (b, g, j, 0)),
            ],
            out_specs=pl.BlockSpec((1, 1, Mq, D), lambda b, g, j: (b, g, 0, 0)),
            scratch_shapes=[
                pltpu.VMEM((Mq, MIN_LANES), jnp.float32),   # running max (replicated)
                pltpu.VMEM((Mq, MIN_LANES), jnp.float32),   # running denom
                pltpu.VMEM((Mq, D), jnp.float32),           # running numerator
            ],
        ),
        compiler_params=pltpu.CompilerParams(
            dimension_semantics=("parallel", "parallel", "arbitrary"),
            vmem_limit_bytes=VMEM_LIMIT,
        ),
    )(q_grouped, k, v)


# --------------------- in-place KV-cache slice writeback --------------------
# cache is aliased input->output (input_output_aliases + jit donation), so only
# the seq_len-sized slice at start_pos moves through HBM, not the whole cache.

def _kv_update_kernel(start_ref, new_ref, cache_hbm_in, cache_hbm_out, sem):
    # new_ref: (B, Hkv, S, D) staged in VMEM by BlockSpec.
    # cache_hbm_*: full (MB, Hkv, MS, D) HBM refs (same buffer, aliased).
    del cache_hbm_in
    B, Hkv, S, D = new_ref.shape
    start = start_ref[0]
    cp = pltpu.make_async_copy(
        new_ref,
        cache_hbm_out.at[pl.ds(0, B), pl.ds(0, Hkv), pl.ds(start, S), pl.ds(0, D)],
        sem,
    )
    cp.start()
    cp.wait()


def _kv_cache_update(cache, new, start):
    B, Hkv, S, D = new.shape
    return pl.pallas_call(
        _kv_update_kernel,
        out_shape=jax.ShapeDtypeStruct(cache.shape, cache.dtype),
        grid_spec=pltpu.PrefetchScalarGridSpec(
            num_scalar_prefetch=1,
            grid=(1,),
            in_specs=[
                pl.BlockSpec((B, Hkv, S, D), lambda i, sp: (0, 0, 0, 0)),
                pl.BlockSpec(memory_space=pl.ANY),          # cache stays in HBM
            ],
            out_specs=pl.BlockSpec(memory_space=pl.ANY),
            scratch_shapes=[pltpu.SemaphoreType.DMA],
        ),
        input_output_aliases={2: 0},   # args are (start, new, cache): cache -> out 0
        compiler_params=pltpu.CompilerParams(
            has_side_effects=True, vmem_limit_bytes=VMEM_LIMIT
        ),
    )(start, new, cache)


_kv_cache_update_jit = jax.jit(_kv_cache_update, donate_argnums=(0,))


# ------------------------------- JAX glue ----------------------------------

def apply_rotary_embeddings(x, freqs_cos, freqs_sin):
    """x: (B, S, H, D). freqs_*: (S, D//2). Complex pair rotation along D."""
    # TODO(synk): fuse RoPE into the QKV-projection epilogue (pltpu.roll with a
    # half-and-half cos/sin layout) to avoid this extra activation round trip.
    B, S, H, D = x.shape
    xr = x.astype(jnp.float32).reshape(B, S, H, D // 2, 2)
    x_re, x_im = xr[..., 0], xr[..., 1]
    cos = freqs_cos[None, :, None, :]
    sin = freqs_sin[None, :, None, :]
    out_re = x_re * cos - x_im * sin
    out_im = x_re * sin + x_im * cos
    out = jnp.stack([out_re, out_im], axis=-1).reshape(B, S, H, D)
    return out.astype(x.dtype)


class SelfAttentionPallas:
    def __init__(self, dim, n_heads, n_kv_heads, max_batch_size, max_seq_len, key):
        self.dim = dim
        self.n_heads_q = n_heads
        self.n_kv_heads = n_kv_heads
        self.n_rep = n_heads // n_kv_heads
        self.head_dim = dim // n_heads
        k1, k2, k3, k4 = jax.random.split(key, 4)
        scale = 0.02
        # f32 master weights in PyTorch nn.Linear layout (out_features, in_features)
        self.wq = scale * jax.random.normal(k1, (n_heads * self.head_dim, dim), jnp.float32)
        self.wk = scale * jax.random.normal(k2, (n_kv_heads * self.head_dim, dim), jnp.float32)
        self.wv = scale * jax.random.normal(k3, (n_kv_heads * self.head_dim, dim), jnp.float32)
        self.wo = scale * jax.random.normal(k4, (dim, n_heads * self.head_dim), jnp.float32)
        # Fused, pre-transposed bf16 QKV weight (K, (Hq+2*Hkv)*D): one-time cost,
        # x read from HBM once per call.  1/sqrt(head_dim) folded into the f32
        # master wq BEFORE the bf16 cast (scaling commutes with RoPE).
        qk_scale = 1.0 / math.sqrt(self.head_dim)
        self.wqkv_t = jnp.concatenate(
            [(self.wq * qk_scale).T, self.wk.T, self.wv.T], axis=1
        ).astype(jnp.bfloat16)
        self.wo_t = self.wo.T.astype(jnp.bfloat16)
        # KV cache stored head-major (B, n_kv, T, D) bf16 so the attention kernel
        # reads it directly (no repeat_kv, no cache transpose).
        self.cache_k = jnp.zeros(
            (max_batch_size, n_kv_heads, max_seq_len, self.head_dim), jnp.bfloat16)
        self.cache_v = jnp.zeros(
            (max_batch_size, n_kv_heads, max_seq_len, self.head_dim), jnp.bfloat16)

    def __call__(self, x, start_pos, freqs_cos, freqs_sin):
        B, S, _ = x.shape
        Hq, Hkv, hd, n_rep = self.n_heads_q, self.n_kv_heads, self.head_dim, self.n_rep
        xb = x.astype(jnp.bfloat16).reshape(B * S, self.dim)

        # Fused Q/K/V projection: one pallas_call, one HBM read of x.
        qkv = linear(xb, self.wqkv_t, jnp.bfloat16)
        nq, nk = Hq * hd, Hkv * hd
        xq = qkv[:, :nq].reshape(B, S, Hq, hd)          # already scaled by 1/sqrt(D)
        xk = qkv[:, nq:nq + nk].reshape(B, S, Hkv, hd)
        xv = qkv[:, nq + nk:].reshape(B, S, Hkv, hd)

        xq = apply_rotary_embeddings(xq, freqs_cos, freqs_sin)
        xk = apply_rotary_embeddings(xk, freqs_cos, freqs_sin)

        # Small head-major transposes of the new tokens only (activation-sized).
        # TODO(synk): fold these into the attention / cache-write BlockSpecs.
        q = jnp.transpose(xq, (0, 2, 1, 3)).reshape(B, Hkv, n_rep * S, hd)
        k_new = jnp.transpose(xk, (0, 2, 1, 3))          # (B, Hkv, S, D)
        v_new = jnp.transpose(xv, (0, 2, 1, 3))

        # In-place (aliased + donated) slice write into the KV cache.
        start = jnp.array([start_pos], dtype=jnp.int32)
        self.cache_k = _kv_cache_update_jit(self.cache_k, k_new, start)
        self.cache_v = _kv_cache_update_jit(self.cache_v, v_new, start)

        T = start_pos + S
        keys = self.cache_k[:B, :, :T]                   # (B, Hkv, T, D) -- no repeat_kv
        values = self.cache_v[:B, :, :T]

        out = flash_attention(q, keys, values)           # (B, Hkv, n_rep*S, D) bf16
        out = out.reshape(B, Hq, S, hd)
        out = jnp.transpose(out, (0, 2, 1, 3)).reshape(B * S, Hq * hd)
        return linear(out, self.wo_t, x.dtype).reshape(B, S, self.dim)


# ------------------------------- reference ---------------------------------

def reference_forward(mod, x, start_pos, freqs_cos, freqs_sin):
    """Pure-jnp f32 replica of the PyTorch forward for verification."""
    B, S, dim = x.shape
    hd, Hq, Hkv, n_rep = mod.head_dim, mod.n_heads_q, mod.n_kv_heads, mod.n_rep
    x2 = x.reshape(B * S, dim)
    xq = (x2 @ mod.wq.T).reshape(B, S, Hq, hd)
    xk = (x2 @ mod.wk.T).reshape(B, S, Hkv, hd)
    xv = (x2 @ mod.wv.T).reshape(B, S, Hkv, hd)
    xq = apply_rotary_embeddings(xq, freqs_cos, freqs_sin)
    xk = apply_rotary_embeddings(xk, freqs_cos, freqs_sin)
    T = start_pos + S
    ck = jnp.zeros((B, T, Hkv, hd), jnp.float32).at[:, start_pos:T].set(xk)
    cv = jnp.zeros((B, T, Hkv, hd), jnp.float32).at[:, start_pos:T].set(xv)
    keys = jnp.repeat(ck, n_rep, axis=2)
    values = jnp.repeat(cv, n_rep, axis=2)
    q = jnp.transpose(xq, (0, 2, 1, 3))
    k = jnp.transpose(keys, (0, 2, 1, 3))
    v = jnp.transpose(values, (0, 2, 1, 3))
    # NOTE: no causal mask — matches the provided PyTorch module exactly.
    scores = jnp.einsum("bhsd,bhtd->bhst", q, k) / math.sqrt(hd)
    scores = jax.nn.softmax(scores.astype(jnp.float32), axis=-1)
    out = jnp.einsum("bhst,bhtd->bhsd", scores, v)
    out = jnp.transpose(out, (0, 2, 1, 3)).reshape(B * S, Hq * hd)
    return (out @ mod.wo.T).reshape(B, S, dim)


# --------------------------------- main -------------------------------------

if __name__ == "__main__":
    # Small-but-aligned config: head_dim=128 keeps all tiles lane-dense, and
    # T = start_pos + seq_len = 512 exercises two tkv=256 KV steps of the
    # online softmax plus the dynamic cache slice write at start_pos=384.
    dim = 512
    n_heads = 4
    n_kv_heads = 2             # n_rep = 2 (GQA head-grouping exercised)
    head_dim = dim // n_heads  # 128
    max_batch_size = 2
    max_seq_len = 512
    batch = 2
    seq_len = 128
    start_pos = 384            # T = 512 -> two KV tiles in the flash loop

    key = jax.random.PRNGKey(0)
    k_mod, k_x = jax.random.split(key)
    mod = SelfAttentionPallas(dim, n_heads, n_kv_heads, max_batch_size, max_seq_len, k_mod)

    x = jax.random.normal(k_x, (batch, seq_len, dim), jnp.float32)

    # Rotary frequencies for positions [start_pos, start_pos + seq_len)
    inv_freq = 1.0 / (10000.0 ** (jnp.arange(0, head_dim, 2, dtype=jnp.float32) / head_dim))
    pos = jnp.arange(start_pos, start_pos + seq_len, dtype=jnp.float32)
    angles = pos[:, None] * inv_freq[None, :]          # (seq_len, head_dim//2)
    freqs_cos = jnp.cos(angles)
    freqs_sin = jnp.sin(angles)

    out = mod(x, start_pos, freqs_cos, freqs_sin)
    out = jax.block_until_ready(out)

    ref = reference_forward(mod, x, start_pos, freqs_cos, freqs_sin)
    assert out.shape == (batch, seq_len, dim)
    max_err = float(jnp.max(jnp.abs(out - ref)))
    assert jnp.allclose(out, ref, atol=2e-2, rtol=2e-2), f"mismatch vs jnp reference (max abs err {max_err})"

    print("KERNEL_OK")
</pallas_src>

<mosaic_0001>
module attributes {stable_mosaic.version = 11 : i64} {
  func.func @matmul_kernel(%arg0: i32, %arg1: i32, %arg2: i32, %arg3: memref<256x512xbf16, #tpu.memory_space<vmem>>, %arg4: memref<512x512xbf16, #tpu.memory_space<vmem>>, %arg5: memref<256x512xbf16, #tpu.memory_space<vmem>>, %arg6: memref<256x512xf32, #tpu.memory_space<vmem>>) attributes {dimension_semantics = [#tpu.dimension_semantics<parallel>, #tpu.dimension_semantics<parallel>, #tpu.dimension_semantics<arbitrary>], iteration_bounds = array<i64: 1, 2, 1>, scalar_prefetch = 0 : i64, scratch_operands = 1 : i64, tpu.core_type = #tpu.core_type<tc>, window_params = [{transform_indices = @transform_0, window_bounds = array<i64: 256, 512>}, {transform_indices = @transform_1, window_bounds = array<i64: 512, 512>}, {transform_indices = @transform_2, window_bounds = array<i64: 256, 512>}]} {
    %c0_i32 = arith.constant 0 : i32
    %0 = arith.cmpi eq, %arg2, %c0_i32 : i32
    %1 = arith.extui %0 : i1 to i32
    %c0_i32_0 = arith.constant 0 : i32
    %2 = arith.cmpi ne, %1, %c0_i32_0 : i32
    scf.if %2 {
      %cst_10 = arith.constant 0.000000e+00 : f32
      %12 = vector.broadcast %cst_10 : f32 to vector<256x512xf32>
      %c0_11 = arith.constant 0 : index
      %c0_12 = arith.constant 0 : index
      %13 = vector.load %arg6[%c0_11, %c0_12] : memref<256x512xf32, #tpu.memory_space<vmem>>, vector<256x512xf32>
      tpu.vector_store %arg6[%c0_11, %c0_12], %12 {strides = array<i32>} : memref<256x512xf32, #tpu.memory_space<vmem>>, vector<256x512xf32>,
    } else {
    }
    %c0 = arith.constant 0 : index
    %c0_1 = arith.constant 0 : index
    %3 = vector.load %arg6[%c0, %c0_1] : memref<256x512xf32, #tpu.memory_space<vmem>>, vector<256x512xf32>
    %c0_2 = arith.constant 0 : index
    %c0_3 = arith.constant 0 : index
    %4 = vector.load %arg3[%c0_2, %c0_3] : memref<256x512xbf16, #tpu.memory_space<vmem>>, vector<256x512xbf16>
    %c0_4 = arith.constant 0 : index
    %c0_5 = arith.constant 0 : index
    %5 = vector.load %arg4[%c0_4, %c0_5] : memref<512x512xbf16, #tpu.memory_space<vmem>>, vector<512x512xbf16>
    %cst = arith.constant dense<0.000000e+00> : vector<256x512xf32>
    %6 = tpu.matmul %4, %5, %cst {dimension_numbers = #tpu.dot_dimension_numbers<[1], [0], [0], [1], [0, 0, 1, 1], [], []>} : vector<256x512xbf16>, vector<512x512xbf16>, vector<256x512xf32> -> vector<256x512xf32>
    %7 = arith.addf %3, %6 : vector<256x512xf32>
    %c0_6 = arith.constant 0 : index
    %c0_7 = arith.constant 0 : index
    %8 = vector.load %arg6[%c0_6, %c0_7] : memref<256x512xf32, #tpu.memory_space<vmem>>, vector<256x512xf32>
    tpu.vector_store %arg6[%c0_6, %c0_7], %7 {strides = array<i32>} : memref<256x512xf32, #tpu.memory_space<vmem>>, vector<256x512xf32>,
    %c0_i32_8 = arith.constant 0 : i32
    %9 = arith.cmpi eq, %arg2, %c0_i32_8 : i32
    %10 = arith.extui %9 : i1 to i32
    %c0_i32_9 = arith.constant 0 : i32
    %11 = arith.cmpi ne, %10, %c0_i32_9 : i32
    scf.if %11 {
      %c0_10 = arith.constant 0 : index
      %c0_11 = arith.constant 0 : index
      %12 = vector.load %arg6[%c0_10, %c0_11] : memref<256x512xf32, #tpu.memory_space<vmem>>, vector<256x512xf32>
      %13 = arith.truncf %12 : vector<256x512xf32> to vector<256x512xbf16>
      %c0_12 = arith.constant 0 : index
      %c0_13 = arith.constant 0 : index
      %14 = vector.load %arg5[%c0_12, %c0_13] : memref<256x512xbf16, #tpu.memory_space<vmem>>, vector<256x512xbf16>
      tpu.vector_store %arg5[%c0_12, %c0_13], %13 {strides = array<i32>} : memref<256x512xbf16, #tpu.memory_space<vmem>>, vector<256x512xbf16>,
    } else {
    }
    return
  }
  func.func @transform_0(%arg0: i32, %arg1: i32, %arg2: i32) -> (i32, i32) {
    %c0_i32 = arith.constant 0 : i32
    return %arg0, %arg2 : i32, i32
  }
  func.func @transform_1(%arg0: i32, %arg1: i32, %arg2: i32) -> (i32, i32) {
    %c0_i32 = arith.constant 0 : i32
    return %arg2, %arg1 : i32, i32
  }
  func.func @transform_2(%arg0: i32, %arg1: i32, %arg2: i32) -> (i32, i32) {
    %c0_i32 = arith.constant 0 : i32
    return %arg0, %arg1 : i32, i32
  }
}

</mosaic_0001>

<bundles_post_ra>
// kernel: tpu_custom_call.1
= control target key start
LH: loop header
LB: loop body
LE: loop exit
PB: predicated region body
PF: predicated region fallthrough
CT: control target
= control target key end

     0   :  { %7 = vsyncpa [#allocation4], 0  ;;  %s4869_s0 = inlined_call_operand.hbm [shape: bf16[256,512], index: 0, kind: input, shape index: {}]   ;;  %s4870_s1 = inlined_call_operand.hbm [shape: bf16[512,1024], index: 1, kind: input, shape index: {}]   ;;  %s4871_s2 = inlined_call_operand.hbm [shape: bf16[256,1024], index: 2, kind: output, shape index: {}]  }
   0x1   :  { %8 = vsyncpa [#allocation7], 0 }
   0x2   :  { %10 = vsyncpa [#allocation7 + $0x1], 0 }
   0x3   :  { %11 = vsyncpa [#allocation5], 0 }
   0x4   :  { %13 = vsyncpa [#allocation5 + $0x1], 0  ;;  %s4235_s9 = smov 0   ;;  %s4237_s10 = smov 0  }
   0x5   :  { %s4239_s11 = smov 0   ;;  %s4241_s12 = smov 0  }
   0x6   :  { %s4243_s13 = smov 0   ;;  %s4245_s14 = smov 0  }
   0x7 LB: > { %4877 = sst [smem:[#allocation12_spill]] %s4209_s14  ;;  %s3365_s15 = sadd.s32 4294967295, %s4209_s14   ;;  %s4209_s14 = sphi %s4245_s14, %s4897_s14   ;;  %s4205_s13 = sphi %s4243_s13, %s4896_s13   ;;  %s4201_s12 = sphi %s4241_s12, %s4895_s12   ;;  %s4197_s11 = sphi %s4239_s11, %s4894_s11   ;;  %s4193_s10 = sphi %s4237_s10, %s4893_s10   ;;  %s4189_s9 = sphi %s4235_s9, %s4892_s9  }
   0x8   : > { %s3366_s16 = sadd.s32 4294967294, %s4209_s14   ;;  %p82_p0 = scmp.ne.s32.totalorder %s4197_s11, %s4193_s10 }
   0x9   : > { %p83_p1 = scmp.eq.s32.totalorder %s4209_s14, 0  ;;  %p88_p2 = scmp.ne.s32.totalorder %s4193_s10, %s4189_s9 }
   0xa   : > { %p4272_p3 = scmp.eq.s32.totalorder %s3365_s15, 0  ;;  %p114_p5 = scmp.eq.s32.totalorder %s3365_s15, 1 }
   0xb   : > { %p4276_p4 = por %p83_p1, %p82_p0  ;;  %p120_p7 = scmp.eq.s32.totalorder %s3366_s16, 1 }
   0xc   : > { %p4282_p6 = por %p4272_p3, %p88_p2  ;;  %p4286_p8 = por %p114_p5, %p82_p0 }
   0xd   : > { %p3367_p9 = scmp.ge.s32.totalorder %s4209_s14, 1  ;;  %p4291_p10 = por %p120_p7, %p88_p2 }
   0xe   : > { %s4880_s19 = scalar_select %p4282_p6, 1, 0 }
   0xf   : > { %s4881_s20 = scalar_select %p4286_p8, 1, 0 }
  0x10   : > { %s4882_s21 = scalar_select %p4291_p10, 1, 0 }
  0x11   : > { %p127_p11 = scmp.lt.s32.totalorder %s4209_s14, 3  ;;  %s4211_s23 = smov [#allocation3]  }
  0x12   : > { %s145_s24 = sshll.u32 %s4211_s23, 4  ;;  %p3725_p1 = scmp.lt.s32.totalorder %s4209_s14, 2  ;;  %s146_s24 = int_to_ptr.vmem [resolvable:$true] %s145_s24 }
  0x13   : > { %p4296_p12 = pnand %p3367_p9, %p127_p11  ;;  %s34_s27 = sadd.s32 1, %s4205_s13 }
  0x14   : > { %p4312_p2 = pnand %p3725_p1, %p4276_p4  ;;  %s4082_s28 = scalar_lea.vmem %s146_s24, 8192 }
  0x15   : > { %p3712_p13 = pneg %p4296_p12  ;;  %p4083_p9 = scmp.ne.s32.totalorder %s146_s24, %s4082_s28 }
  0x16   : > { %p4090_p0 = scmp.lt.s32.totalorder %s146_s24, %s146_s24  ;;  %p4091_p8 = scmp.lt.s32.totalorder %s4082_s28, %s4082_s28 }
  0x17   : > { %p4306_p5 = pnand %p3712_p13, %p4272_p3 }
  0x18   : > { %p4092_p6 = por %p4091_p8, %p4090_p0 }
  0x19   : > { %p4073_p7 = pneg %p4306_p5 }
  0x1b   : > { %p4085_p11 = pnand %p4083_p9, %p4073_p7 }
  0x1d   : > { %p4086_p10 = pneg %p4085_p11 }
  0x1f   : > { %p4093_p13 = pnand %p4092_p6, %p4086_p10 }
  0x21   : > { %4096 = shalt.err (!%p4093_p13)
}
  0x22   : > { %s4876_s29 = smov 256   ;;  %s4213_s30 = smov 16  }
  0x23   : > { %3715 = dma.hbm_to_vmem [thread:$0]  (!%p4306_p5), %s4869_s0, 8192, %s146_s24, [#allocation4], %s4876_s29, %s4876_s29, %s4213_s30  }
  0x24   : > { %p36_p4 = scmp.ge.s32.totalorder %s34_s27, 2  ;;  %s75_s5 = sadd.s32 1, %s4197_s11 }
  0x25   : > { %s159_s6 = sand.u32 1, %s4197_s11   ;;  %s3638_s15 = sshll.u32 %s4205_s13, 8 }
  0x26   : > { %s4899_s27 = smov (%p36_p4, %s34_s27), 0  ;;  %s3370_s7 = sshll.u32 %s159_s6, 10 }
  0x27   : > { %s71_s8 = ssub.s32 %s4205_s13, %s4899_s27  ;;  %s172_s23 = scalar_lea.hbm %s4870_s1, %s3638_s15 }
  0x28   : > { %p73_p6 = scmp.eq.s32.totalorder %s71_s8, 0  ;;  %s163_s25 = scalar_lea.vmem [#allocation6], %s3370_s7 }
  0x29   : > { %s173_s28 = sshll.u32 %s163_s25, 4  ;;  %s160_s24 = scalar_lea.sflag [#allocation7], %s159_s6  ;;  %s174_s28 = int_to_ptr.vmem [resolvable:$true] %s173_s28 }
  0x2a   : > { %s4338_s14 = scalar_select %p73_p6, %s4197_s11, %s75_s5  }
  0x2b   : > { %p4099_p8 = pneg %p4312_p2  ;;  %s4110_s3 = scalar_lea.vmem %s174_s28, 16384 }
  0x2c   : > { %p4111_p10 = scmp.ne.s32.totalorder %s174_s28, %s4110_s3  ;;  %s4214_s4 = smov [#allocation6]  }
  0x2d   : > { %s4115_s29 = sshll.u32 %s4214_s4, 4  ;;  %s4116_s29 = int_to_ptr.vmem [resolvable:$false] %s4115_s29 }
  0x2e   : > { %p4113_p0 = pnand %p4111_p10, %p4099_p8  ;;  %s4117_s8 = scalar_lea.vmem %s4116_s29, 32768 }
  0x2f   : > { %p4118_p5 = scmp.lt.s32.totalorder %s174_s28, %s4116_s29  ;;  %p4119_p7 = scmp.lt.s32.totalorder %s4117_s8, %s4110_s3 }
  0x30   : > { %p4114_p1 = pneg %p4113_p0 }
  0x31   : > { %p4120_p9 = por %p4119_p7, %p4118_p5 }
  0x33   : > { %p4121_p11 = pnand %p4120_p9, %p4114_p1 }
  0x35   : > { %4124 = shalt.err (!%p4121_p11)
}
  0x36   : > { %s4215_s7 = smov 512   ;;  %s4886_s5 = smov 256  }
  0x37   : > { %3719 = dma.hbm_to_vmem [thread:$0]  (!%p4312_p2), %s172_s23, 16384, %s174_s28, %s160_s24, %s4215_s7, %s4886_s5, %s4213_s30  }
  0x38   : > { %185 = sbr.rel (%p4296_p12) target bundleno = 598 (0x256), region = 28 }
  0x3d   : > { %4176 = dma.done.wait (%p4272_p3), [#allocation4], 8192  }
  0x3e   : > { %4178 = vsyncadd (%p4272_p3), [#allocation4], 4294959104  ;;  %s4353_s29 = sand.u32 1, %s4193_s10   ;;  %p4887_p2 = scmp.ne.s32.totalorder %s4880_s19, 0 }
  0x3f   : > { %s3375_s6 = sshll.u32 %s4353_s29, 10  ;;  %s192_s26 = scalar_lea.sflag [#allocation7], %s4353_s29 }
  0x40   : > { %s4357_s15 = scalar_lea.vmem [#allocation6], %s3375_s6 }
  0x41   : > { %4180 = dma.done.wait (%p4887_p2), %s192_s26, 16384  }
  0x42   : > { %4182 = vsyncadd (%p4887_p2), %s192_s26, 4294950912  ;;  %v3783_v0 = vld [vmem:[%s4357_s15 + $0xe4] ss:$16 sps:$4 sm:$0xff]   ;;  %v3787_v2 = vld [vmem:[%s4357_s15 + $0xe0] ss:$16 sps:$4 sm:$0xff]   ;;  %s3376_s17 = sshll.u32 %s4353_s29, 9 }
  0x43   : > { %v3785_v1 = vld [vmem:[%s4357_s15 + $0x2e4] ss:$16 sps:$4 sm:$0xff]   ;;  %1634 = vmatprep.subr.bf16.mxu0 %v3783_v0  ;;  %v3788_v3 = vld [vmem:[%s4357_s15 + $0x2e0] ss:$16 sps:$4 sm:$0xff]   ;;  %v4415_v51 = vld [vmem:[#allocation3 + $0xc] ss:$16 sps:$4 sm:$0xff]  }
  0x44   : > { %1827 = vmatprep.subr.bf16.mxu1 %v3785_v1  ;;  %v3789_v4 = vld [vmem:[%s4357_s15 + $0xc4] ss:$16 sps:$4 sm:$0xff]   ;;  %1635 = vmatpush1.bf16.msra.mxu0 %v3787_v2  ;;  %v3793_v6 = vld [vmem:[%s4357_s15 + $0xc0] ss:$16 sps:$4 sm:$0xff]   ;;  %v3887_v2 = vld [vmem:[%s4357_s15 + $0xec] ss:$16 sps:$4 sm:$0xff]  }
  0x45   : > { %1828 = vmatpush1.bf16.msra.mxu1 %v3788_v3  ;;  %v3791_v5 = vld [vmem:[%s4357_s15 + $0x2c4] ss:$16 sps:$4 sm:$0xff]   ;;  %1636 = vmatprep.subr.bf16.mxu0 %v3789_v4  ;;  %v3794_v7 = vld [vmem:[%s4357_s15 + $0x2c0] ss:$16 sps:$4 sm:$0xff]   ;;  %v3890_v3 = vld [vmem:[%s4357_s15 + $0x2ec] ss:$16 sps:$4 sm:$0xff]  }
  0x46   : > { %1829 = vmatprep.subr.bf16.mxu1 %v3791_v5  ;;  %v3795_v8 = vld [vmem:[%s4357_s15 + $0xa4] ss:$16 sps:$4 sm:$0xff]   ;;  %v3799_v10 = vld [vmem:[%s4357_s15 + $0xa0] ss:$16 sps:$4 sm:$0xff]   ;;  %1859 = vmatprep.mubr.bf16.mxu1 %v4415_v51  ;;  %v4437_v5 = vld [vmem:[#allocation3 + $0x8] ss:$16 sps:$4 sm:$0xff]  }
  0x47   : > { %v3797_v9 = vld [vmem:[%s4357_s15 + $0x2a4] ss:$16 sps:$4 sm:$0xff]   ;;  %v3800_v11 = vld [vmem:[%s4357_s15 + $0x2a0] ss:$16 sps:$4 sm:$0xff]   ;;  %s4722_s19 = scalar_lea.vmem [#allocation8], %s3376_s17  ;;  %s3703_s22 = sshll.u32 %s4201_s12, 8 }
  0x48   : > { %1637 = vmatpush1.bf16.msra.mxu0 %v3793_v6  ;;  %v3801_v12 = vld [vmem:[%s4357_s15 + $0x84] ss:$16 sps:$4 sm:$0xff]   ;;  %v3805_v14 = vld [vmem:[%s4357_s15 + $0x80] ss:$16 sps:$4 sm:$0xff]   ;;  %v3885_v6 = vld [vmem:[%s4357_s15 + $0xe8] ss:$16 sps:$4 sm:$0xff]   ;;  %s4818_s23 = scalar_lea.hbm %s4871_s2, %s3703_s22 }
  0x49   : > { %1830 = vmatpush1.bf16.msra.mxu1 %v3794_v7  ;;  %1638 = vmatprep.subr.bf16.mxu0 %v3795_v8  ;;  %v3803_v13 = vld [vmem:[%s4357_s15 + $0x284] ss:$16 sps:$4 sm:$0xff]   ;;  %v3806_v15 = vld [vmem:[%s4357_s15 + $0x280] ss:$16 sps:$4 sm:$0xff]   ;;  %v3888_v7 = vld [vmem:[%s4357_s15 + $0x2e8] ss:$16 sps:$4 sm:$0xff]  }
  0x4a   : > { %1831 = vmatprep.subr.bf16.mxu1 %v3797_v9  ;;  %v3807_v16 = vld [vmem:[%s4357_s15 + $0x64] ss:$16 sps:$4 sm:$0xff]   ;;  %v3811_v18 = vld [vmem:[%s4357_s15 + $0x60] ss:$16 sps:$4 sm:$0xff]   ;;  %v4443_v9 = vld [vmem:[#allocation3 + $0x2c] ss:$16 sps:$4 sm:$0xff]  }
  0x4b   : > { %v3809_v17 = vld [vmem:[%s4357_s15 + $0x264] ss:$16 sps:$4 sm:$0xff]   ;;  %v3812_v19 = vld [vmem:[%s4357_s15 + $0x260] ss:$16 sps:$4 sm:$0xff]   ;;  %s3258_s30 = sshll.u32 %s4722_s19, 4  ;;  %s3242_s12 = scalar_lea.sflag [#allocation5], %s4353_s29  ;;  %s4820_s30 = int_to_ptr.vmem [resolvable:$true] %s3258_s30 }
  0x4c   : > { %1639 = vmatpush1.bf16.msra.mxu0 %v3799_v10  ;;  %v3813_v20 = vld [vmem:[%s4357_s15 + $0x44] ss:$16 sps:$4 sm:$0xff]   ;;  %v3817_v22 = vld [vmem:[%s4357_s15 + $0x40] ss:$16 sps:$4 sm:$0xff]   ;;  %v3899_v10 = vld [vmem:[%s4357_s15 + $0xcc] ss:$16 sps:$4 sm:$0xff]  }
  0x4d   : > { %1832 = vmatpush1.bf16.msra.mxu1 %v3800_v11  ;;  %1640 = vmatprep.subr.bf16.mxu0 %v3801_v12  ;;  %v3815_v21 = vld [vmem:[%s4357_s15 + $0x244] ss:$16 sps:$4 sm:$0xff]   ;;  %v3818_v23 = vld [vmem:[%s4357_s15 + $0x240] ss:$16 sps:$4 sm:$0xff]   ;;  %v3902_v11 = vld [vmem:[%s4357_s15 + $0x2cc] ss:$16 sps:$4 sm:$0xff]  }
  0x4e   : > { %1833 = vmatprep.subr.bf16.mxu1 %v3803_v13  ;;  %v3819_v24 = vld [vmem:[%s4357_s15 + $0x24] ss:$16 sps:$4 sm:$0xff]   ;;  %v3823_v26 = vld [vmem:[%s4357_s15 + $0x20] ss:$16 sps:$4 sm:$0xff]   ;;  %v3897_v12 = vld [vmem:[%s4357_s15 + $0xc8] ss:$16 sps:$4 sm:$0xff]  }
  0x4f   : > { %v3821_v25 = vld [vmem:[%s4357_s15 + $0x224] ss:$16 sps:$4 sm:$0xff]   ;;  %v3824_v27 = vld [vmem:[%s4357_s15 + $0x220] ss:$16 sps:$4 sm:$0xff]   ;;  %v3900_v13 = vld [vmem:[%s4357_s15 + $0x2c8] ss:$16 sps:$4 sm:$0xff]  }
  0x50   : > { %1641 = vmatpush1.bf16.msra.mxu0 %v3805_v14  ;;  %v3825_v28 = vld [vmem:[%s4357_s15 + $0x4] ss:$16 sps:$4 sm:$0xff]   ;;  %v3829_v30 = vld [vmem:[%s4357_s15] ss:$16 sps:$4 sm:$0xff]   ;;  %v3911_v14 = vld [vmem:[%s4357_s15 + $0xac] ss:$16 sps:$4 sm:$0xff]  }
  0x51   : > { %1834 = vmatpush1.bf16.msra.mxu1 %v3806_v15  ;;  %1642 = vmatprep.subr.bf16.mxu0 %v3807_v16  ;;  %v3827_v29 = vld [vmem:[%s4357_s15 + $0x204] ss:$16 sps:$4 sm:$0xff]   ;;  %v3830_v31 = vld [vmem:[%s4357_s15 + $0x200] ss:$16 sps:$4 sm:$0xff]   ;;  %v3914_v15 = vld [vmem:[%s4357_s15 + $0x2ac] ss:$16 sps:$4 sm:$0xff]  }
  0x52   : > { %1835 = vmatprep.subr.bf16.mxu1 %v3809_v17  ;;  %v3831_v32 = vld [vmem:[%s4357_s15 + $0x1e4] ss:$16 sps:$4 sm:$0xff]   ;;  %v3835_v34 = vld [vmem:[%s4357_s15 + $0x1e0] ss:$16 sps:$4 sm:$0xff]   ;;  %v4457_v17 = vld [vmem:[#allocation3 + $0x28] ss:$16 sps:$4 sm:$0xff]  }
  0x53   : > { %v3833_v33 = vld [vmem:[%s4357_s15 + $0x3e4] ss:$16 sps:$4 sm:$0xff]   ;;  %v3836_v35 = vld [vmem:[%s4357_s15 + $0x3e0] ss:$16 sps:$4 sm:$0xff]   ;;  %s4125_s25 = scalar_lea.vmem %s4820_s30, 8192  ;;  %p4888_p12 = scmp.ne.s32.totalorder %s4881_s20, 0 }
  0x54   : > { %1643 = vmatpush1.bf16.msra.mxu0 %v3811_v18  ;;  %v3837_v36 = vld [vmem:[%s4357_s15 + $0x1c4] ss:$16 sps:$4 sm:$0xff]   ;;  %v3841_v38 = vld [vmem:[%s4357_s15 + $0x1c0] ss:$16 sps:$4 sm:$0xff]   ;;  %p4126_p3 = scmp.ne.s32.totalorder %s4820_s30, %s4125_s25  ;;  %s4216_s28 = smov [#allocation8]  }
  0x55   : > { %1836 = vmatpush1.bf16.msra.mxu1 %v3812_v19  ;;  %1644 = vmatprep.subr.bf16.mxu0 %v3813_v20  ;;  %v3839_v37 = vld [vmem:[%s4357_s15 + $0x3c4] ss:$16 sps:$4 sm:$0xff]   ;;  %v3842_v39 = vld [vmem:[%s4357_s15 + $0x3c0] ss:$16 sps:$4 sm:$0xff]   ;;  %v4461_v19 = vld [vmem:[#allocation3 + $0x4c] ss:$16 sps:$4 sm:$0xff]  }
  0x56   : > { %1837 = vmatprep.subr.bf16.mxu1 %v3815_v21  ;;  %v3843_v40 = vld [vmem:[%s4357_s15 + $0x1a4] ss:$16 sps:$4 sm:$0xff]   ;;  %v3847_v42 = vld [vmem:[%s4357_s15 + $0x1a0] ss:$16 sps:$4 sm:$0xff]   ;;  %v3909_v20 = vld [vmem:[%s4357_s15 + $0xa8] ss:$16 sps:$4 sm:$0xff]   ;;  %p4127_p13 = pnand %p4126_p3, %p4888_p12 }
  0x57   : > { %v3845_v41 = vld [vmem:[%s4357_s15 + $0x3a4] ss:$16 sps:$4 sm:$0xff]   ;;  %v3848_v43 = vld [vmem:[%s4357_s15 + $0x3a0] ss:$16 sps:$4 sm:$0xff]   ;;  %v3912_v21 = vld [vmem:[%s4357_s15 + $0x2a8] ss:$16 sps:$4 sm:$0xff]  }
  0x58   : > { %1645 = vmatpush1.bf16.msra.mxu0 %v3817_v22  ;;  %v3849_v44 = vld [vmem:[%s4357_s15 + $0x184] ss:$16 sps:$4 sm:$0xff]   ;;  %v3853_v46 = vld [vmem:[%s4357_s15 + $0x180] ss:$16 sps:$4 sm:$0xff]   ;;  %v3923_v22 = vld [vmem:[%s4357_s15 + $0x8c] ss:$16 sps:$4 sm:$0xff]   ;;  %p4128_p4 = pneg %p4127_p13 }
  0x59   : > { %1838 = vmatpush1.bf16.msra.mxu1 %v3818_v23  ;;  %1646 = vmatprep.subr.bf16.mxu0 %v3819_v24  ;;  %v3851_v45 = vld [vmem:[%s4357_s15 + $0x384] ss:$16 sps:$4 sm:$0xff]   ;;  %v3854_v47 = vld [vmem:[%s4357_s15 + $0x380] ss:$16 sps:$4 sm:$0xff]   ;;  %v3926_v23 = vld [vmem:[%s4357_s15 + $0x28c] ss:$16 sps:$4 sm:$0xff]  }
  0x5a   : > { %1839 = vmatprep.subr.bf16.mxu1 %v3821_v25  ;;  %v3855_v48 = vld [vmem:[%s4357_s15 + $0x164] ss:$16 sps:$4 sm:$0xff]   ;;  %v3859_v52 = vld [vmem:[%s4357_s15 + $0x160] ss:$16 sps:$4 sm:$0xff]   ;;  %v3921_v24 = vld [vmem:[%s4357_s15 + $0x88] ss:$16 sps:$4 sm:$0xff]  }
  0x5b   : > { %v4412_v49 = vld [vmem:[#allocation3 + $0x4] ss:$16 sps:$4 sm:$0xff]   ;;  %v3860_v53 = vld [vmem:[%s4357_s15 + $0x360] ss:$16 sps:$4 sm:$0xff]   ;;  %s4129_s24 = sshll.u32 %s4216_s28, 4  ;;  %s4130_s24 = int_to_ptr.vmem [resolvable:$false] %s4129_s24 }
  0x5c   : > { %1647 = vmatpush1.bf16.msra.mxu0 %v3823_v26  ;;  %v3857_v50 = vld [vmem:[%s4357_s15 + $0x364] ss:$16 sps:$4 sm:$0xff]   ;;  %1666 = vmatprep.mubr.bf16.mxu0 %v4412_v49  ;;  %v3865_v56 = vld [vmem:[%s4357_s15 + $0x140] ss:$16 sps:$4 sm:$0xff]   ;;  %v4474_v26 = vld [vmem:[#allocation3 + $0x48] ss:$16 sps:$4 sm:$0xff]   ;;  %p4132_p6 = scmp.lt.s32.totalorder %s4820_s30, %s4130_s24 }
  0x5d   : > { %1840 = vmatpush1.bf16.msra.mxu1 %v3824_v27  ;;  %1648 = vmatprep.subr.bf16.mxu0 %v3825_v28  ;;  %v3861_v54 = vld [vmem:[%s4357_s15 + $0x144] ss:$16 sps:$4 sm:$0xff]   ;;  %v3866_v57 = vld [vmem:[%s4357_s15 + $0x340] ss:$16 sps:$4 sm:$0xff]   ;;  %v3924_v27 = vld [vmem:[%s4357_s15 + $0x288] ss:$16 sps:$4 sm:$0xff]  }
  0x5e   : > { %1841 = vmatprep.subr.bf16.mxu1 %v3827_v29  ;;  %v3863_v55 = vld [vmem:[%s4357_s15 + $0x344] ss:$16 sps:$4 sm:$0xff]   ;;  %v3871_v60 = vld [vmem:[%s4357_s15 + $0x120] ss:$16 sps:$4 sm:$0xff]   ;;  %v3935_v28 = vld [vmem:[%s4357_s15 + $0x6c] ss:$16 sps:$4 sm:$0xff]  }
  0x5f   : > { %v3867_v58 = vld [vmem:[%s4357_s15 + $0x124] ss:$16 sps:$4 sm:$0xff]   ;;  %v3872_v61 = vld [vmem:[%s4357_s15 + $0x320] ss:$16 sps:$4 sm:$0xff]   ;;  %v3938_v29 = vld [vmem:[%s4357_s15 + $0x26c] ss:$16 sps:$4 sm:$0xff]  }
  0x60   : > { %1649 = vmatpush1.bf16.msra.mxu0 %v3829_v30  ;;  %v3869_v59 = vld [vmem:[%s4357_s15 + $0x324] ss:$16 sps:$4 sm:$0xff]   ;;  %v3877_v0 = vld [vmem:[%s4357_s15 + $0x100] ss:$16 sps:$4 sm:$0xff]   ;;  %s4131_s3 = scalar_lea.vmem %s4130_s24, 16384 }
  0x61   : > { %1842 = vmatpush1.bf16.msra.mxu1 %v3830_v31  ;;  %1650 = vmatprep.subr.bf16.mxu0 %v3831_v32  ;;  %v3873_v62 = vld [vmem:[%s4357_s15 + $0x104] ss:$16 sps:$4 sm:$0xff]   ;;  %v3878_v1 = vld [vmem:[%s4357_s15 + $0x300] ss:$16 sps:$4 sm:$0xff]   ;;  %v4481_v31 = vld [vmem:[#allocation3 + $0x6c] ss:$16 sps:$4 sm:$0xff]   ;;  %p4133_p8 = scmp.lt.s32.totalorder %s4131_s3, %s4125_s25 }
  0x62   : > { %1843 = vmatprep.subr.bf16.mxu1 %v3833_v33  ;;  %v3875_v63 = vld [vmem:[%s4357_s15 + $0x304] ss:$16 sps:$4 sm:$0xff]   ;;  %v4435_v4 = vld [vmem:[#allocation3] ss:$16 sps:$4 sm:$0xff]   ;;  %v3933_v32 = vld [vmem:[%s4357_s15 + $0x68] ss:$16 sps:$4 sm:$0xff]  }
  0x63   : > { %v4441_v8 = vld [vmem:[#allocation3 + $0x24] ss:$16 sps:$4 sm:$0xff]   ;;  %v4455_v16 = vld [vmem:[#allocation3 + $0x20] ss:$16 sps:$4 sm:$0xff]   ;;  %v3936_v33 = vld [vmem:[%s4357_s15 + $0x268] ss:$16 sps:$4 sm:$0xff]   ;;  %p4134_p10 = por %p4133_p8, %p4132_p6 }
  0x64   : > { %1651 = vmatpush2.bf16.msra.mxu0 %v3835_v34  ;;  %v4459_v18 = vld [vmem:[#allocation3 + $0x44] ss:$16 sps:$4 sm:$0xff]   ;;  %v4472_v25 = vld [vmem:[#allocation3 + $0x40] ss:$16 sps:$4 sm:$0xff]   ;;  %v3947_v34 = vld [vmem:[%s4357_s15 + $0x4c] ss:$16 sps:$4 sm:$0xff]  }
  0x65   : > { %1844 = vmatpush2.bf16.msra.mxu1 %v3836_v35  ;;  %1652 = vmatprep.subr.bf16.mxu0 %v3837_v36  ;;  %v4479_v30 = vld [vmem:[#allocation3 + $0x64] ss:$16 sps:$4 sm:$0xff]   ;;  %v3950_v35 = vld [vmem:[%s4357_s15 + $0x24c] ss:$16 sps:$4 sm:$0xff]   ;;  %v3945_v36 = vld [vmem:[%s4357_s15 + $0x48] ss:$16 sps:$4 sm:$0xff]   ;;  %p4135_p0 = pnand %p4134_p10, %p4128_p4 }
  0x66   : > { %1845 = vmatprep.subr.bf16.mxu1 %v3839_v37  ;;  %v3948_v37 = vld [vmem:[%s4357_s15 + $0x248] ss:$16 sps:$4 sm:$0xff]  }
  0x68   : > { %1653 = vmatpush2.bf16.msra.mxu0 %v3841_v38  ;;  %v4493_v38 = vld [vmem:[#allocation3 + $0x60] ss:$16 sps:$4 sm:$0xff]  }
  0x69   : > { %1846 = vmatpush2.bf16.msra.mxu1 %v3842_v39  ;;  %1654 = vmatprep.subr.bf16.mxu0 %v3843_v40  ;;  %v3959_v39 = vld [vmem:[%s4357_s15 + $0x2c] ss:$16 sps:$4 sm:$0xff]  }
  0x6a   : > { %1847 = vmatprep.subr.bf16.mxu1 %v3845_v41  ;;  %v3962_v40 = vld [vmem:[%s4357_s15 + $0x22c] ss:$16 sps:$4 sm:$0xff]   ;;  %v4497_v41 = vld [vmem:[#allocation3 + $0x68] ss:$16 sps:$4 sm:$0xff]  }
  0x6c   : > { %1655 = vmatpush2.bf16.msra.mxu0 %v3847_v42  ;;  %v4499_v42 = vld [vmem:[#allocation3 + $0x84] ss:$16 sps:$4 sm:$0xff]  }
  0x6d   : > { %1848 = vmatpush2.bf16.msra.mxu1 %v3848_v43  ;;  %1656 = vmatprep.subr.bf16.mxu0 %v3849_v44  ;;  %v4501_v43 = vld [vmem:[#allocation3 + $0x8c] ss:$16 sps:$4 sm:$0xff]   ;;  %v3957_v44 = vld [vmem:[%s4357_s15 + $0x28] ss:$16 sps:$4 sm:$0xff]  }
  0x6e   : > { %1849 = vmatprep.subr.bf16.mxu1 %v3851_v45  ;;  %v3960_v45 = vld [vmem:[%s4357_s15 + $0x228] ss:$16 sps:$4 sm:$0xff]  }
  0x70   : > { %1657 = vmatpush2.bf16.msra.mxu0 %v3853_v46  ;;  %v3971_v46 = vld [vmem:[%s4357_s15 + $0xc] ss:$16 sps:$4 sm:$0xff]  }
  0x71   : > { %1850 = vmatpush2.bf16.msra.mxu1 %v3854_v47  ;;  %1658 = vmatprep.subr.bf16.mxu0 %v3855_v48  ;;  %v3974_v47 = vld [vmem:[%s4357_s15 + $0x20c] ss:$16 sps:$4 sm:$0xff]   ;;  %v3969_v48 = vld [vmem:[%s4357_s15 + $0x8] ss:$16 sps:$4 sm:$0xff]  }
  0x72   : > { %1851 = vmatprep.subr.bf16.mxu1 %v3857_v50  ;;  %v4512_v50 = vld [vmem:[#allocation3 + $0x80] ss:$16 sps:$4 sm:$0xff]  }
  0x74   : > { %1659 = vmatpush2.bf16.msra.mxu0 %v3859_v52  ;;  %v4514_v52 = vld [vmem:[#allocation3 + $0x88] ss:$16 sps:$4 sm:$0xff]  }
  0x75   : > { %1852 = vmatpush2.bf16.msra.mxu1 %v3860_v53  ;;  %1660 = vmatprep.subr.bf16.mxu0 %v3861_v54  ;;  %v3972_v53 = vld [vmem:[%s4357_s15 + $0x208] ss:$16 sps:$4 sm:$0xff]   ;;  %v3983_v54 = vld [vmem:[%s4357_s15 + $0x1ec] ss:$16 sps:$4 sm:$0xff]  }
  0x76   : > { %1853 = vmatprep.subr.bf16.mxu1 %v3863_v55  ;;  %v3986_v55 = vld [vmem:[%s4357_s15 + $0x3ec] ss:$16 sps:$4 sm:$0xff]  }
  0x78   : > { %1661 = vmatpush2.bf16.msra.mxu0 %v3865_v56  ;;  %v4519_v56 = vld [vmem:[#allocation3 + $0xa4] ss:$16 sps:$4 sm:$0xff]  }
  0x79   : > { %1854 = vmatpush2.bf16.msra.mxu1 %v3866_v57  ;;  %1662 = vmatprep.subr.bf16.mxu0 %v3867_v58  ;;  %v4521_v57 = vld [vmem:[#allocation3 + $0xac] ss:$16 sps:$4 sm:$0xff]   ;;  %v3981_v58 = vld [vmem:[%s4357_s15 + $0x1e8] ss:$16 sps:$4 sm:$0xff]  }
  0x7a   : > { %1855 = vmatprep.subr.bf16.mxu1 %v3869_v59  ;;  %v3984_v59 = vld [vmem:[%s4357_s15 + $0x3e8] ss:$16 sps:$4 sm:$0xff]  }
  0x7c   : > { %1663 = vmatpush2.bf16.msra.mxu0 %v3871_v60  ;;  %v3995_v60 = vld [vmem:[%s4357_s15 + $0x1cc] ss:$16 sps:$4 sm:$0xff]  }
  0x7d   : > { %1856 = vmatpush2.bf16.msra.mxu1 %v3872_v61  ;;  %1664 = vmatprep.subr.bf16.mxu0 %v3873_v62  ;;  %v3998_v61 = vld [vmem:[%s4357_s15 + $0x3cc] ss:$16 sps:$4 sm:$0xff]   ;;  %v3993_v62 = vld [vmem:[%s4357_s15 + $0x1c8] ss:$16 sps:$4 sm:$0xff]  }
  0x7e   : > { %1857 = vmatprep.subr.bf16.mxu1 %v3875_v63  ;;  %v3996_v63 = vld [vmem:[%s4357_s15 + $0x3c8] ss:$16 sps:$4 sm:$0xff]  }
  0x80   : > { %1665 = vmatpush2.bf16.msra.mxu0 %v3877_v0  ;;  %v4533_v0 = vld [vmem:[#allocation3 + $0xa0] ss:$16 sps:$4 sm:$0xff]  }
  0x81   : > { %1858 = vmatpush2.bf16.msra.mxu1 %v3878_v1  ;;  %2020 = vmatprep.subr.bf16.mxu0 %v3887_v2  ;;  %v4007_v1 = vld [vmem:[%s4357_s15 + $0x1ac] ss:$16 sps:$4 sm:$0xff]  }
  0x82   : > { %2213 = vmatprep.subr.bf16.mxu1 %v3890_v3  ;;  %v4010_v2 = vld [vmem:[%s4357_s15 + $0x3ac] ss:$16 sps:$4 sm:$0xff]   ;;  %v4537_v3 = vld [vmem:[#allocation3 + $0xa8] ss:$16 sps:$4 sm:$0xff]  }
  0x83   : > { %1667 = vmatmul.mubr.bf16.vlgmr.msra.gmra.mxu0 %v4435_v4 }
  0x84   : > { %1860 = vmatmul.mubr.bf16.vlgmr.msra.gmra.mxu1 %v4437_v5  ;;  %2021 = vmatpush1.bf16.msra.mxu0 %v3885_v6  ;;  %v4539_v6 = vld [vmem:[#allocation3 + $0xc4] ss:$16 sps:$4 sm:$0xff]  }
  0x85   : > { %2214 = vmatpush1.bf16.msra.mxu1 %v3888_v7  ;;  %1676 = vmatprep.mubr.bf16.mxu0 %v4441_v8  ;;  %v4541_v7 = vld [vmem:[#allocation3 + $0xcc] ss:$16 sps:$4 sm:$0xff]  }
  0x86   : > { %1869 = vmatprep.mubr.bf16.mxu1 %v4443_v9  ;;  %2022 = vmatprep.subr.bf16.mxu0 %v3899_v10  ;;  %v4005_v10 = vld [vmem:[%s4357_s15 + $0x1a8] ss:$16 sps:$4 sm:$0xff]  }
  0x87   : > { %2215 = vmatprep.subr.bf16.mxu1 %v3902_v11  ;;  %v4008_v11 = vld [vmem:[%s4357_s15 + $0x3a8] ss:$16 sps:$4 sm:$0xff]  }
  0x88   : > { %2023 = vmatpush1.bf16.msra.mxu0 %v3897_v12  ;;  %v4019_v12 = vld [vmem:[%s4357_s15 + $0x18c] ss:$16 sps:$4 sm:$0xff]  }
  0x89   : > { %2216 = vmatpush1.bf16.msra.mxu1 %v3900_v13  ;;  %2024 = vmatprep.subr.bf16.mxu0 %v3911_v14  ;;  %v4022_v13 = vld [vmem:[%s4357_s15 + $0x38c] ss:$16 sps:$4 sm:$0xff]   ;;  %v4017_v14 = vld [vmem:[%s4357_s15 + $0x188] ss:$16 sps:$4 sm:$0xff]  }
  0x8a   : > { %2217 = vmatprep.subr.bf16.mxu1 %v3914_v15  ;;  %v4552_v15 = vld [vmem:[#allocation3 + $0xc0] ss:$16 sps:$4 sm:$0xff]  }
  0x8b   : > { %1677 = vmatmul.mubr.bf16.gmra.mxu0 %v4455_v16 }
  0x8c   : > { %1870 = vmatmul.mubr.bf16.gmra.mxu1 %v4457_v17  ;;  %1686 = vmatprep.mubr.bf16.mxu0 %v4459_v18 }
  0x8d   : > { %1879 = vmatprep.mubr.bf16.mxu1 %v4461_v19  ;;  %2025 = vmatpush1.bf16.msra.mxu0 %v3909_v20  ;;  %v4554_v20 = vld [vmem:[#allocation3 + $0xc8] ss:$16 sps:$4 sm:$0xff]  }
  0x8e   : > { %2218 = vmatpush1.bf16.msra.mxu1 %v3912_v21  ;;  %2026 = vmatprep.subr.bf16.mxu0 %v3923_v22  ;;  %v4020_v21 = vld [vmem:[%s4357_s15 + $0x388] ss:$16 sps:$4 sm:$0xff]   ;;  %v4557_v22 = vld [vmem:[#allocation3 + $0xe4] ss:$16 sps:$4 sm:$0xff]  }
  0x8f   : > { %2219 = vmatprep.subr.bf16.mxu1 %v3926_v23  ;;  %v4031_v23 = vld [vmem:[%s4357_s15 + $0x16c] ss:$16 sps:$4 sm:$0xff]  }
  0x91   : > { %2027 = vmatpush1.bf16.msra.mxu0 %v3921_v24  ;;  %v4560_v24 = vld [vmem:[#allocation3 + $0xec] ss:$16 sps:$4 sm:$0xff]  }
  0x92   : > { %2220 = vmatpush1.bf16.msra.mxu1 %v3924_v27  ;;  %2028 = vmatprep.subr.bf16.mxu0 %v3935_v28  ;;  %v4034_v27 = vld [vmem:[%s4357_s15 + $0x36c] ss:$16 sps:$4 sm:$0xff]   ;;  %v4029_v28 = vld [vmem:[%s4357_s15 + $0x168] ss:$16 sps:$4 sm:$0xff]  }
  0x93   : > { %2221 = vmatprep.subr.bf16.mxu1 %v3938_v29  ;;  %1687 = vmatmul.mubr.bf16.gmra.mxu0 %v4472_v25  ;;  %v4032_v29 = vld [vmem:[%s4357_s15 + $0x368] ss:$16 sps:$4 sm:$0xff]  }
  0x94   : > { %1880 = vmatmul.mubr.bf16.gmra.mxu1 %v4474_v26  ;;  %1696 = vmatprep.mubr.bf16.mxu0 %v4479_v30 }
  0x95   : > { %1889 = vmatprep.mubr.bf16.mxu1 %v4481_v31  ;;  %2029 = vmatpush1.bf16.msra.mxu0 %v3933_v32  ;;  %v4041_v32 = vld [vmem:[%s4357_s15 + $0x148] ss:$16 sps:$4 sm:$0xff]  }
  0x96   : > { %2222 = vmatpush1.bf16.msra.mxu1 %v3936_v33  ;;  %2030 = vmatprep.subr.bf16.mxu0 %v3947_v34  ;;  %v4043_v33 = vld [vmem:[%s4357_s15 + $0x14c] ss:$16 sps:$4 sm:$0xff]   ;;  %v4044_v34 = vld [vmem:[%s4357_s15 + $0x348] ss:$16 sps:$4 sm:$0xff]  }
  0x97   : > { %2223 = vmatprep.subr.bf16.mxu1 %v3950_v35  ;;  %v4046_v35 = vld [vmem:[%s4357_s15 + $0x34c] ss:$16 sps:$4 sm:$0xff]  }
  0x99   : > { %2031 = vmatpush1.bf16.msra.mxu0 %v3945_v36  ;;  %v4573_v36 = vld [vmem:[#allocation3 + $0xe0] ss:$16 sps:$4 sm:$0xff]  }
  0x9a   : > { %2224 = vmatpush1.bf16.msra.mxu1 %v3948_v37  ;;  %2032 = vmatprep.subr.bf16.mxu0 %v3959_v39  ;;  %v4575_v37 = vld [vmem:[#allocation3 + $0xe8] ss:$16 sps:$4 sm:$0xff]   ;;  %v4577_v39 = vld [vmem:[#allocation3 + $0x104] ss:$16 sps:$4 sm:$0xff]  }
  0x9b   : > { %2225 = vmatprep.subr.bf16.mxu1 %v3962_v40  ;;  %1697 = vmatmul.mubr.bf16.gmra.mxu0 %v4493_v38  ;;  %v4579_v40 = vld [vmem:[#allocation3 + $0x10c] ss:$16 sps:$4 sm:$0xff]  }
  0x9c   : > { %1890 = vmatmul.mubr.bf16.gmra.mxu1 %v4497_v41  ;;  %1706 = vmatprep.mubr.bf16.mxu0 %v4499_v42 }
  0x9d   : > { %1899 = vmatprep.mubr.bf16.mxu1 %v4501_v43  ;;  %2033 = vmatpush1.bf16.msra.mxu0 %v3957_v44  ;;  %v4053_v44 = vld [vmem:[%s4357_s15 + $0x128] ss:$16 sps:$4 sm:$0xff]  }
  0x9e   : > { %2226 = vmatpush1.bf16.msra.mxu1 %v3960_v45  ;;  %2034 = vmatprep.subr.bf16.mxu0 %v3971_v46  ;;  %v4055_v45 = vld [vmem:[%s4357_s15 + $0x12c] ss:$16 sps:$4 sm:$0xff]   ;;  %v4056_v46 = vld [vmem:[%s4357_s15 + $0x328] ss:$16 sps:$4 sm:$0xff]  }
  0x9f   : > { %2227 = vmatprep.subr.bf16.mxu1 %v3974_v47  ;;  %v4058_v47 = vld [vmem:[%s4357_s15 + $0x32c] ss:$16 sps:$4 sm:$0xff]  }
  0xa1   : > { %2035 = vmatpush1.bf16.msra.mxu0 %v3969_v48  ;;  %v4589_v48 = vld [vmem:[#allocation3 + $0x100] ss:$16 sps:$4 sm:$0xff]  }
  0xa2   : > { %2228 = vmatpush1.bf16.msra.mxu1 %v3972_v53  ;;  %2036 = vmatprep.subr.bf16.mxu0 %v3983_v54  ;;  %v4591_v53 = vld [vmem:[#allocation3 + $0x108] ss:$16 sps:$4 sm:$0xff]  }
  0xa3   : > { %2229 = vmatprep.subr.bf16.mxu1 %v3986_v55  ;;  %1707 = vmatmul.mubr.bf16.gmra.mxu0 %v4512_v50  ;;  %v4065_v54 = vld [vmem:[%s4357_s15 + $0x108] ss:$16 sps:$4 sm:$0xff]   ;;  %v4067_v55 = vld [vmem:[%s4357_s15 + $0x10c] ss:$16 sps:$4 sm:$0xff]  }
  0xa4   : > { %1900 = vmatmul.mubr.bf16.gmra.mxu1 %v4514_v52  ;;  %1716 = vmatprep.mubr.bf16.mxu0 %v4519_v56 }
  0xa5   : > { %1909 = vmatprep.mubr.bf16.mxu1 %v4521_v57  ;;  %2037 = vmatpush2.bf16.msra.mxu0 %v3981_v58  ;;  %v4068_v58 = vld [vmem:[%s4357_s15 + $0x308] ss:$16 sps:$4 sm:$0xff]  }
  0xa6   : > { %2230 = vmatpush2.bf16.msra.mxu1 %v3984_v59  ;;  %2038 = vmatprep.subr.bf16.mxu0 %v3995_v60  ;;  %v4070_v59 = vld [vmem:[%s4357_s15 + $0x30c] ss:$16 sps:$4 sm:$0xff]   ;;  %v4597_v60 = vld [vmem:[#allocation3 + $0x124] ss:$16 sps:$4 sm:$0xff]  }
  0xa7   : > { %2231 = vmatprep.subr.bf16.mxu1 %v3998_v61  ;;  %v4599_v61 = vld [vmem:[#allocation3 + $0x12c] ss:$16 sps:$4 sm:$0xff]  }
  0xa9   : > { %2039 = vmatpush2.bf16.msra.mxu0 %v3993_v62  ;;  %v4605_v62 = vld [vmem:[#allocation3 + $0x120] ss:$16 sps:$4 sm:$0xff]  }
  0xaa   : > { %2232 = vmatpush2.bf16.msra.mxu1 %v3996_v63  ;;  %2040 = vmatprep.subr.bf16.mxu0 %v4007_v1  ;;  %v4607_v63 = vld [vmem:[#allocation3 + $0x128] ss:$16 sps:$4 sm:$0xff]   ;;  %v4609_v1 = vld [vmem:[#allocation3 + $0x144] ss:$16 sps:$4 sm:$0xff]  }
  0xab   : > { %2233 = vmatprep.subr.bf16.mxu1 %v4010_v2  ;;  %1717 = vmatmul.mubr.bf16.gmra.mxu0 %v4533_v0  ;;  %v4611_v2 = vld [vmem:[#allocation3 + $0x14c] ss:$16 sps:$4 sm:$0xff]  }
  0xac   : > { %1910 = vmatmul.mubr.bf16.gmra.mxu1 %v4537_v3  ;;  %1726 = vmatprep.mubr.bf16.mxu0 %v4539_v6 }
  0xad   : > { %1919 = vmatprep.mubr.bf16.mxu1 %v4541_v7  ;;  %2041 = vmatpush2.bf16.msra.mxu0 %v4005_v10  ;;  %v4617_v10 = vld [vmem:[#allocation3 + $0x140] ss:$16 sps:$4 sm:$0xff]  }
  0xae   : > { %2234 = vmatpush2.bf16.msra.mxu1 %v4008_v11  ;;  %2042 = vmatprep.subr.bf16.mxu0 %v4019_v12  ;;  %v4619_v11 = vld [vmem:[#allocation3 + $0x148] ss:$16 sps:$4 sm:$0xff]   ;;  %v4621_v12 = vld [vmem:[#allocation3 + $0x164] ss:$16 sps:$4 sm:$0xff]  }
  0xaf   : > { %2235 = vmatprep.subr.bf16.mxu1 %v4022_v13  ;;  %v4623_v13 = vld [vmem:[#allocation3 + $0x16c] ss:$16 sps:$4 sm:$0xff]  }
  0xb1   : > { %2043 = vmatpush2.bf16.msra.mxu0 %v4017_v14  ;;  %v4629_v14 = vld [vmem:[#allocation3 + $0x160] ss:$16 sps:$4 sm:$0xff]  }
  0xb2   : > { %2236 = vmatpush2.bf16.msra.mxu1 %v4020_v21  ;;  %2044 = vmatprep.subr.bf16.mxu0 %v4031_v23  ;;  %v4631_v21 = vld [vmem:[#allocation3 + $0x168] ss:$16 sps:$4 sm:$0xff]   ;;  %v4633_v23 = vld [vmem:[#allocation3 + $0x184] ss:$16 sps:$4 sm:$0xff]  }
  0xb3   : > { %2237 = vmatprep.subr.bf16.mxu1 %v4034_v27  ;;  %1727 = vmatmul.mubr.bf16.gmra.mxu0 %v4552_v15  ;;  %v4635_v27 = vld [vmem:[#allocation3 + $0x18c] ss:$16 sps:$4 sm:$0xff]  }
  0xb4   : > { %1920 = vmatmul.mubr.bf16.gmra.mxu1 %v4554_v20  ;;  %1736 = vmatprep.mubr.bf16.mxu0 %v4557_v22 }
  0xb5   : > { %1929 = vmatprep.mubr.bf16.mxu1 %v4560_v24  ;;  %2045 = vmatpush2.bf16.msra.mxu0 %v4029_v28  ;;  %v4641_v28 = vld [vmem:[#allocation3 + $0x180] ss:$16 sps:$4 sm:$0xff]  }
  0xb6   : > { %2238 = vmatpush2.bf16.msra.mxu1 %v4032_v29  ;;  %2046 = vmatprep.subr.bf16.mxu0 %v4043_v33  ;;  %v4643_v29 = vld [vmem:[#allocation3 + $0x188] ss:$16 sps:$4 sm:$0xff]   ;;  %v4647_v33 = vld [vmem:[#allocation3 + $0x1ac] ss:$16 sps:$4 sm:$0xff]  }
  0xb7   : > { %2239 = vmatprep.subr.bf16.mxu1 %v4046_v35  ;;  %v4655_v35 = vld [vmem:[#allocation3 + $0x1a8] ss:$16 sps:$4 sm:$0xff]  }
  0xb9   : > { %2047 = vmatpush2.bf16.msra.mxu0 %v4041_v32  ;;  %v4645_v32 = vld [vmem:[#allocation3 + $0x1a4] ss:$16 sps:$4 sm:$0xff]  }
  0xba   : > { %2240 = vmatpush2.bf16.msra.mxu1 %v4044_v34  ;;  %2048 = vmatprep.subr.bf16.mxu0 %v4055_v45  ;;  %v4653_v34 = vld [vmem:[#allocation3 + $0x1a0] ss:$16 sps:$4 sm:$0xff]   ;;  %v4659_v45 = vld [vmem:[#allocation3 + $0x1cc] ss:$16 sps:$4 sm:$0xff]  }
  0xbb   : > { %1737 = vmatmul.mubr.bf16.gmra.mxu0 %v4573_v36  ;;  %2241 = vmatprep.subr.bf16.mxu1 %v4058_v47  ;;  %v4667_v47 = vld [vmem:[#allocation3 + $0x1c8] ss:$16 sps:$4 sm:$0xff]  }
  0xbc   : > { %1930 = vmatmul.mubr.bf16.gmra.mxu1 %v4575_v37  ;;  %1746 = vmatprep.mubr.bf16.mxu0 %v4577_v39 }
  0xbd   : > { %1939 = vmatprep.mubr.bf16.mxu1 %v4579_v40  ;;  %2049 = vmatpush2.bf16.msra.mxu0 %v4053_v44  ;;  %v4657_v44 = vld [vmem:[#allocation3 + $0x1c4] ss:$16 sps:$4 sm:$0xff]  }
  0xbe   : > { %2242 = vmatpush2.bf16.msra.mxu1 %v4056_v46  ;;  %2050 = vmatprep.subr.bf16.mxu0 %v4067_v55  ;;  %v4665_v46 = vld [vmem:[#allocation3 + $0x1c0] ss:$16 sps:$4 sm:$0xff]   ;;  %v4671_v55 = vld [vmem:[#allocation3 + $0x1ec] ss:$16 sps:$4 sm:$0xff]  }
  0xbf   : > { %2243 = vmatprep.subr.bf16.mxu1 %v4070_v59  ;;  %v4679_v59 = vld [vmem:[#allocation3 + $0x1e8] ss:$16 sps:$4 sm:$0xff]  }
  0xc1   : > { %2051 = vmatpush2.bf16.msra.mxu0 %v4065_v54  ;;  %v4669_v54 = vld [vmem:[#allocation3 + $0x1e4] ss:$16 sps:$4 sm:$0xff]  }
  0xc2   : > { %2244 = vmatpush2.bf16.msra.mxu1 %v4068_v58  ;;  %v4677_v58 = vld [vmem:[#allocation3 + $0x1e0] ss:$16 sps:$4 sm:$0xff]  }
  0xc3   : > { %1747 = vmatmul.mubr.bf16.gmra.mxu0 %v4589_v48 }
  0xc4   : > { %1940 = vmatmul.mubr.bf16.gmra.mxu1 %v4591_v53  ;;  %1756 = vmatprep.mubr.bf16.mxu0 %v4597_v60 }
  0xc5   : > { %1949 = vmatprep.mubr.bf16.mxu1 %v4599_v61 }
  0xcb   : > { %1757 = vmatmul.mubr.bf16.gmra.mxu0 %v4605_v62 }
  0xcc   : > { %1950 = vmatmul.mubr.bf16.gmra.mxu1 %v4607_v63  ;;  %1766 = vmatprep.mubr.bf16.mxu0 %v4609_v1 }
  0xcd   : > { %1959 = vmatprep.mubr.bf16.mxu1 %v4611_v2 }
  0xd3   : > { %1767 = vmatmul.mubr.bf16.gmra.mxu0 %v4617_v10 }
  0xd4   : > { %1960 = vmatmul.mubr.bf16.gmra.mxu1 %v4619_v11  ;;  %1776 = vmatprep.mubr.bf16.mxu0 %v4621_v12 }
  0xd5   : > { %1969 = vmatprep.mubr.bf16.mxu1 %v4623_v13 }
  0xdb   : > { %1777 = vmatmul.mubr.bf16.gmra.mxu0 %v4629_v14 }
  0xdc   : > { %1970 = vmatmul.mubr.bf16.gmra.mxu1 %v4631_v21  ;;  %1786 = vmatprep.mubr.bf16.mxu0 %v4633_v23 }
  0xdd   : > { %1979 = vmatprep.mubr.bf16.mxu1 %v4635_v27 }
  0xe3   : > { %1787 = vmatmul.mubr.bf16.gmra.mxu0 %v4641_v28 }
  0xe4   : > { %1980 = vmatmul.mubr.bf16.gmra.mxu1 %v4643_v29  ;;  %1796 = vmatprep.mubr.bf16.mxu0 %v4645_v32 }
  0xe5   : > { %1989 = vmatprep.mubr.bf16.mxu1 %v4647_v33 }
  0xeb   : > { %1797 = vmatmul.mubr.bf16.gmra.mxu0 %v4653_v34 }
  0xec   : > { %1990 = vmatmul.mubr.bf16.gmra.mxu1 %v4655_v35  ;;  %1806 = vmatprep.mubr.bf16.mxu0 %v4657_v44 }
  0xed   : > { %1999 = vmatprep.mubr.bf16.mxu1 %v4659_v45 }
  0xf3   : > { %1807 = vmatmul.mubr.bf16.gmra.mxu0 %v4665_v46 }
  0xf4   : > { %2000 = vmatmul.mubr.bf16.gmra.mxu1 %v4667_v47  ;;  %1816 = vmatprep.mubr.bf16.mxu0 %v4669_v54 }
  0xf5   : > { %2009 = vmatprep.mubr.bf16.mxu1 %v4671_v55 }
  0xfb   : > { %1817 = vmatmul.mubr.bf16.gmra.mxu0 %v4677_v58 }
  0xfc   : > { %2010 = vmatmul.mubr.bf16.gmra.mxu1 %v4679_v59  ;;  %2052 = vmatprep.mubr.bf16.mxu0 %v4412_v49 }
  0xfd   : > { %2245 = vmatprep.mubr.bf16.mxu1 %v4415_v51 }
 0x103   : > { %2053 = vmatmul.mubr.bf16.vlgmr.msra.gmra.mxu0 %v4435_v4 }
 0x104   : > { %2246 = vmatmul.mubr.bf16.vlgmr.msra.gmra.mxu1 %v4437_v5  ;;  %2062 = vmatprep.mubr.bf16.mxu0 %v4441_v8 }
 0x105   : > { %2255 = vmatprep.mubr.bf16.mxu1 %v4443_v9 }
 0x10b   : > { %2063 = vmatmul.mubr.bf16.gmra.mxu0 %v4455_v16 }
 0x10c   : > { %2256 = vmatmul.mubr.bf16.gmra.mxu1 %v4457_v17  ;;  %2072 = vmatprep.mubr.bf16.mxu0 %v4459_v18 }
 0x10d   : > { %2265 = vmatprep.mubr.bf16.mxu1 %v4461_v19 }
 0x113   : > { %2073 = vmatmul.mubr.bf16.gmra.mxu0 %v4472_v25 }
 0x114   : > { %2266 = vmatmul.mubr.bf16.gmra.mxu1 %v4474_v26  ;;  %2082 = vmatprep.mubr.bf16.mxu0 %v4479_v30 }
 0x115   : > { %2275 = vmatprep.mubr.bf16.mxu1 %v4481_v31 }
 0x11b   : > { %2083 = vmatmul.mubr.bf16.gmra.mxu0 %v4493_v38 }
 0x11c   : > { %2276 = vmatmul.mubr.bf16.gmra.mxu1 %v4497_v41  ;;  %2092 = vmatprep.mubr.bf16.mxu0 %v4499_v42 }
 0x11d   : > { %2285 = vmatprep.mubr.bf16.mxu1 %v4501_v43 }
 0x123   : > { %2093 = vmatmul.mubr.bf16.gmra.mxu0 %v4512_v50 }
 0x124   : > { %2286 = vmatmul.mubr.bf16.gmra.mxu1 %v4514_v52  ;;  %2102 = vmatprep.mubr.bf16.mxu0 %v4519_v56 }
 0x125   : > { %2295 = vmatprep.mubr.bf16.mxu1 %v4521_v57 }
 0x12b   : > { %2103 = vmatmul.mubr.bf16.gmra.mxu0 %v4533_v0 }
 0x12c   : > { %2296 = vmatmul.mubr.bf16.gmra.mxu1 %v4537_v3  ;;  %2112 = vmatprep.mubr.bf16.mxu0 %v4539_v6 }
 0x12d   : > { %2305 = vmatprep.mubr.bf16.mxu1 %v4541_v7 }
 0x133   : > { %2113 = vmatmul.mubr.bf16.gmra.mxu0 %v4552_v15 }
 0x134   : > { %2306 = vmatmul.mubr.bf16.gmra.mxu1 %v4554_v20  ;;  %2122 = vmatprep.mubr.bf16.mxu0 %v4557_v22 }
 0x135   : > { %2315 = vmatprep.mubr.bf16.mxu1 %v4560_v24 }
 0x13b   : > { %2123 = vmatmul.mubr.bf16.gmra.mxu0 %v4573_v36 }
 0x13c   : > { %2316 = vmatmul.mubr.bf16.gmra.mxu1 %v4575_v37  ;;  %2132 = vmatprep.mubr.bf16.mxu0 %v4577_v39 }
 0x13d   : > { %2325 = vmatprep.mubr.bf16.mxu1 %v4579_v40 }
 0x143   : > { %v1668_v49 = vpop.f32.mrf.mxu0  ;;  %2133 = vmatmul.mubr.bf16.gmra.mxu0 %v4589_v48 }
 0x144   : > { %v1861_v51 = vpop.f32.mrf.mxu1  ;;  %2326 = vmatmul.mubr.bf16.gmra.mxu1 %v4591_v53  ;;  %2142 = vmatprep.mubr.bf16.mxu0 %v4597_v60 }
 0x145   : > { %2335 = vmatprep.mubr.bf16.mxu1 %v4599_v61  ;;  %v1670_v4 = vpop.f32.mrf.mxu0  ;;  %v1862_v8 = vadd.f32 %v1861_v51, %v1668_v49 }
 0x146   : > { %v1863_v5 = vpop.f32.mrf.mxu1 }
 0x147   : > { %v1864_v9 = vadd.f32 %v1863_v5, %v1670_v4  ;;  %v1672_v16 = vpop.f32.mrf.mxu0 }
 0x148   : > { %v1865_v17 = vpop.f32.mrf.mxu1 }
 0x149   : > { %v3639_v18 = vpack.c.bf16 %v1864_v9, %v1862_v8  ;;  %v1674_v19 = vpop.f32.mrf.mxu0  ;;  %v1866_v26 = vadd.f32 %v1865_v17, %v1672_v16 }
 0x14a   : > { %v1867_v25 = vpop.f32.mrf.mxu1 }
 0x14b   : > { %3177 = vst [vmem:[%s4722_s19] sm:$0xff] %v3639_v18  ;;  %v1868_v30 = vadd.f32 %v1867_v25, %v1674_v19  ;;  %v1678_v31 = vpop.f32.mrf.mxu0  ;;  %2143 = vmatmul.mubr.bf16.gmra.mxu0 %v4605_v62 }
 0x14c   : > { %v1871_v38 = vpop.f32.mrf.mxu1  ;;  %2336 = vmatmul.mubr.bf16.gmra.mxu1 %v4607_v63  ;;  %2152 = vmatprep.mubr.bf16.mxu0 %v4609_v1 }
 0x14d   : > { %v3641_v41 = vpack.c.bf16 %v1868_v30, %v1866_v26  ;;  %2345 = vmatprep.mubr.bf16.mxu1 %v4611_v2  ;;  %v1680_v42 = vpop.f32.mrf.mxu0  ;;  %v1872_v50 = vadd.f32 %v1871_v38, %v1678_v31 }
 0x14e   : > { %v1873_v43 = vpop.f32.mrf.mxu1 }
 0x14f   : > { %3179 = vst [vmem:[%s4722_s19 + $0x10] sm:$0xff] %v3641_v41  ;;  %v1874_v52 = vadd.f32 %v1873_v43, %v1680_v42  ;;  %v1682_v56 = vpop.f32.mrf.mxu0 }
 0x150   : > { %v1875_v57 = vpop.f32.mrf.mxu1 }
 0x151   : > { %v3643_v0 = vpack.c.bf16 %v1874_v52, %v1872_v50  ;;  %v1684_v3 = vpop.f32.mrf.mxu0  ;;  %v1876_v7 = vadd.f32 %v1875_v57, %v1682_v56 }
 0x152   : > { %v1877_v6 = vpop.f32.mrf.mxu1 }
 0x153   : > { %3181 = vst [vmem:[%s4722_s19 + $0x20] sm:$0xff] %v3643_v0  ;;  %v1878_v15 = vadd.f32 %v1877_v6, %v1684_v3  ;;  %v1688_v20 = vpop.f32.mrf.mxu0  ;;  %2153 = vmatmul.mubr.bf16.gmra.mxu0 %v4617_v10 }
 0x154   : > { %v1881_v22 = vpop.f32.mrf.mxu1  ;;  %2346 = vmatmul.mubr.bf16.gmra.mxu1 %v4619_v11  ;;  %2162 = vmatprep.mubr.bf16.mxu0 %v4621_v12 }
 0x155   : > { %v3645_v24 = vpack.c.bf16 %v1878_v15, %v1876_v7  ;;  %2355 = vmatprep.mubr.bf16.mxu1 %v4623_v13  ;;  %v1690_v36 = vpop.f32.mrf.mxu0  ;;  %v1882_v39 = vadd.f32 %v1881_v22, %v1688_v20 }
 0x156   : > { %v1883_v37 = vpop.f32.mrf.mxu1 }
 0x157   : > { %3183 = vst [vmem:[%s4722_s19 + $0x30] sm:$0xff] %v3645_v24  ;;  %v1884_v40 = vadd.f32 %v1883_v37, %v1690_v36  ;;  %v1692_v48 = vpop.f32.mrf.mxu0 }
 0x158   : > { %v1885_v53 = vpop.f32.mrf.mxu1 }
 0x159   : > { %v3647_v60 = vpack.c.bf16 %v1884_v40, %v1882_v39  ;;  %v1694_v61 = vpop.f32.mrf.mxu0  ;;  %v1886_v63 = vadd.f32 %v1885_v53, %v1692_v48 }
 0x15a   : > { %v1887_v62 = vpop.f32.mrf.mxu1 }
 0x15b   : > { %3185 = vst [vmem:[%s4722_s19 + $0x40] sm:$0xff] %v3647_v60  ;;  %v1888_v1 = vadd.f32 %v1887_v62, %v1694_v61  ;;  %v1698_v2 = vpop.f32.mrf.mxu0  ;;  %2163 = vmatmul.mubr.bf16.gmra.mxu0 %v4629_v14 }
 0x15c   : > { %v1891_v10 = vpop.f32.mrf.mxu1  ;;  %2356 = vmatmul.mubr.bf16.gmra.mxu1 %v4631_v21  ;;  %2172 = vmatprep.mubr.bf16.mxu0 %v4633_v23 }
 0x15d   : > { %v3649_v11 = vpack.c.bf16 %v1888_v1, %v1886_v63  ;;  %2365 = vmatprep.mubr.bf16.mxu1 %v4635_v27  ;;  %v1700_v12 = vpop.f32.mrf.mxu0  ;;  %v1892_v49 = vadd.f32 %v1891_v10, %v1698_v2 }
 0x15e   : > { %v1893_v13 = vpop.f32.mrf.mxu1 }
 0x15f   : > { %3187 = vst [vmem:[%s4722_s19 + $0x50] sm:$0xff] %v3649_v11  ;;  %v1894_v51 = vadd.f32 %v1893_v13, %v1700_v12  ;;  %v1702_v4 = vpop.f32.mrf.mxu0 }
 0x160   : > { %v1895_v5 = vpop.f32.mrf.mxu1 }
 0x161   : > { %v3651_v8 = vpack.c.bf16 %v1894_v51, %v1892_v49  ;;  %v1704_v9 = vpop.f32.mrf.mxu0  ;;  %v1896_v14 = vadd.f32 %v1895_v5, %v1702_v4 }
 0x162   : > { %v1897_v16 = vpop.f32.mrf.mxu1 }
 0x163   : > { %3189 = vst [vmem:[%s4722_s19 + $0x60] sm:$0xff] %v3651_v8  ;;  %v1898_v17 = vadd.f32 %v1897_v16, %v1704_v9  ;;  %v1708_v21 = vpop.f32.mrf.mxu0  ;;  %2173 = vmatmul.mubr.bf16.gmra.mxu0 %v4641_v28 }
 0x164   : > { %v1901_v18 = vpop.f32.mrf.mxu1  ;;  %2366 = vmatmul.mubr.bf16.gmra.mxu1 %v4643_v29  ;;  %2182 = vmatprep.mubr.bf16.mxu0 %v4645_v32 }
 0x165   : > { %v3653_v23 = vpack.c.bf16 %v1898_v17, %v1896_v14  ;;  %2375 = vmatprep.mubr.bf16.mxu1 %v4647_v33  ;;  %v1710_v27 = vpop.f32.mrf.mxu0  ;;  %v1902_v25 = vadd.f32 %v1901_v18, %v1708_v21 }
 0x166   : > { %v1903_v19 = vpop.f32.mrf.mxu1 }
 0x167   : > { %3191 = vst [vmem:[%s4722_s19 + $0x70] sm:$0xff] %v3653_v23  ;;  %v1904_v26 = vadd.f32 %v1903_v19, %v1710_v27  ;;  %v1712_v30 = vpop.f32.mrf.mxu0 }
 0x168   : > { %v1905_v31 = vpop.f32.mrf.mxu1 }
 0x169   : > { %v3655_v38 = vpack.c.bf16 %v1904_v26, %v1902_v25  ;;  %v1714_v41 = vpop.f32.mrf.mxu0  ;;  %v1906_v28 = vadd.f32 %v1905_v31, %v1712_v30 }
 0x16a   : > { %v1907_v42 = vpop.f32.mrf.mxu1 }
 0x16b   : > { %3193 = vst [vmem:[%s4722_s19 + $0x80] sm:$0xff] %v3655_v38  ;;  %v1908_v43 = vadd.f32 %v1907_v42, %v1714_v41  ;;  %v1718_v29 = vpop.f32.mrf.mxu0  ;;  %2183 = vmatmul.mubr.bf16.gmra.mxu0 %v4653_v34 }
 0x16c   : > { %v1911_v50 = vpop.f32.mrf.mxu1  ;;  %2376 = vmatmul.mubr.bf16.gmra.mxu1 %v4655_v35  ;;  %2192 = vmatprep.mubr.bf16.mxu0 %v4657_v44 }
 0x16d   : > { %v3657_v32 = vpack.c.bf16 %v1908_v43, %v1906_v28  ;;  %2385 = vmatprep.mubr.bf16.mxu1 %v4659_v45  ;;  %v1720_v33 = vpop.f32.mrf.mxu0  ;;  %v1912_v56 = vadd.f32 %v1911_v50, %v1718_v29 }
 0x16e   : > { %v1913_v52 = vpop.f32.mrf.mxu1 }
 0x16f   : > { %3195 = vst [vmem:[%s4722_s19 + $0x90] sm:$0xff] %v3657_v32  ;;  %v1914_v57 = vadd.f32 %v1913_v52, %v1720_v33  ;;  %v1722_v0 = vpop.f32.mrf.mxu0 }
 0x170   : > { %v1915_v3 = vpop.f32.mrf.mxu1 }
 0x171   : > { %v3659_v6 = vpack.c.bf16 %v1914_v57, %v1912_v56  ;;  %v1724_v7 = vpop.f32.mrf.mxu0  ;;  %v1916_v34 = vadd.f32 %v1915_v3, %v1722_v0 }
 0x172   : > { %v1917_v15 = vpop.f32.mrf.mxu1 }
 0x173   : > { %3197 = vst [vmem:[%s4722_s19 + $0xa0] sm:$0xff] %v3659_v6  ;;  %v1918_v20 = vadd.f32 %v1917_v15, %v1724_v7  ;;  %v1728_v35 = vpop.f32.mrf.mxu0  ;;  %2193 = vmatmul.mubr.bf16.gmra.mxu0 %v4665_v46 }
 0x174   : > { %v1921_v22 = vpop.f32.mrf.mxu1  ;;  %2386 = vmatmul.mubr.bf16.gmra.mxu1 %v4667_v47  ;;  %2202 = vmatprep.mubr.bf16.mxu0 %v4669_v54 }
 0x175   : > { %v3661_v44 = vpack.c.bf16 %v1918_v20, %v1916_v34  ;;  %2395 = vmatprep.mubr.bf16.mxu1 %v4671_v55  ;;  %v1730_v45 = vpop.f32.mrf.mxu0  ;;  %v1922_v36 = vadd.f32 %v1921_v22, %v1728_v35 }
 0x176   : > { %v1923_v24 = vpop.f32.mrf.mxu1 }
 0x177   : > { %3199 = vst [vmem:[%s4722_s19 + $0xb0] sm:$0xff] %v3661_v44  ;;  %v1924_v37 = vadd.f32 %v1923_v24, %v1730_v45  ;;  %v1732_v39 = vpop.f32.mrf.mxu0 }
 0x178   : > { %v1925_v40 = vpop.f32.mrf.mxu1 }
 0x179   : > { %v3663_v48 = vpack.c.bf16 %v1924_v37, %v1922_v36  ;;  %v1734_v53 = vpop.f32.mrf.mxu0  ;;  %v1926_v46 = vadd.f32 %v1925_v40, %v1732_v39 }
 0x17a   : > { %v1927_v60 = vpop.f32.mrf.mxu1 }
 0x17b   : > { %3201 = vst [vmem:[%s4722_s19 + $0xc0] sm:$0xff] %v3663_v48  ;;  %v1928_v61 = vadd.f32 %v1927_v60, %v1734_v53  ;;  %v1738_v47 = vpop.f32.mrf.mxu0  ;;  %2203 = vmatmul.mubr.bf16.gmra.mxu0 %v4677_v58 }
 0x17c   : > { %v1931_v62 = vpop.f32.mrf.mxu1  ;;  %2396 = vmatmul.mubr.bf16.gmra.mxu1 %v4679_v59 }
 0x17d   : > { %v3665_v54 = vpack.c.bf16 %v1928_v61, %v1926_v46  ;;  %v1740_v55 = vpop.f32.mrf.mxu0  ;;  %v1932_v1 = vadd.f32 %v1931_v62, %v1738_v47 }
 0x17e   : > { %v1933_v63 = vpop.f32.mrf.mxu1 }
 0x17f   : > { %3203 = vst [vmem:[%s4722_s19 + $0xd0] sm:$0xff] %v3665_v54  ;;  %v1934_v2 = vadd.f32 %v1933_v63, %v1740_v55  ;;  %v1742_v10 = vpop.f32.mrf.mxu0 }
 0x180   : > { %v1935_v11 = vpop.f32.mrf.mxu1 }
 0x181   : > { %v3667_v12 = vpack.c.bf16 %v1934_v2, %v1932_v1  ;;  %v1744_v13 = vpop.f32.mrf.mxu0  ;;  %v1936_v51 = vadd.f32 %v1935_v11, %v1742_v10 }
 0x182   : > { %v1937_v49 = vpop.f32.mrf.mxu1 }
 0x183   : > { %3205 = vst [vmem:[%s4722_s19 + $0xe0] sm:$0xff] %v3667_v12  ;;  %v1938_v4 = vadd.f32 %v1937_v49, %v1744_v13  ;;  %v1748_v5 = vpop.f32.mrf.mxu0 }
 0x184   : > { %v1941_v58 = vpop.f32.mrf.mxu1 }
 0x185   : > { %v3669_v8 = vpack.c.bf16 %v1938_v4, %v1936_v51  ;;  %v1750_v59 = vpop.f32.mrf.mxu0  ;;  %v1942_v16 = vadd.f32 %v1941_v58, %v1748_v5 }
 0x186   : > { %v1943_v9 = vpop.f32.mrf.mxu1 }
 0x187   : > { %3207 = vst [vmem:[%s4722_s19 + $0xf0] sm:$0xff] %v3669_v8  ;;  %v1944_v14 = vadd.f32 %v1943_v9, %v1750_v59  ;;  %v1752_v17 = vpop.f32.mrf.mxu0 }
 0x188   : > { %v1945_v21 = vpop.f32.mrf.mxu1 }
 0x189   : > { %v3671_v18 = vpack.c.bf16 %v1944_v14, %v1942_v16  ;;  %v1754_v23 = vpop.f32.mrf.mxu0  ;;  %v1946_v19 = vadd.f32 %v1945_v21, %v1752_v17 }
 0x18a   : > { %v1947_v27 = vpop.f32.mrf.mxu1 }
 0x18b   : > { %3209 = vst [vmem:[%s4722_s19 + $0x100] sm:$0xff] %v3671_v18  ;;  %v1948_v25 = vadd.f32 %v1947_v27, %v1754_v23  ;;  %v1758_v26 = vpop.f32.mrf.mxu0 }
 0x18c   : > { %v1951_v30 = vpop.f32.mrf.mxu1 }
 0x18d   : > { %v3673_v31 = vpack.c.bf16 %v1948_v25, %v1946_v19  ;;  %v1760_v38 = vpop.f32.mrf.mxu0  ;;  %v1952_v42 = vadd.f32 %v1951_v30, %v1758_v26 }
 0x18e   : > { %v1953_v41 = vpop.f32.mrf.mxu1 }
 0x18f   : > { %3211 = vst [vmem:[%s4722_s19 + $0x110] sm:$0xff] %v3673_v31  ;;  %v1954_v28 = vadd.f32 %v1953_v41, %v1760_v38  ;;  %v1762_v43 = vpop.f32.mrf.mxu0 }
 0x190   : > { %v1955_v29 = vpop.f32.mrf.mxu1 }
 0x191   : > { %v3675_v50 = vpack.c.bf16 %v1954_v28, %v1952_v42  ;;  %v1764_v32 = vpop.f32.mrf.mxu0  ;;  %v1956_v52 = vadd.f32 %v1955_v29, %v1762_v43 }
 0x192   : > { %v1957_v33 = vpop.f32.mrf.mxu1 }
 0x193   : > { %3213 = vst [vmem:[%s4722_s19 + $0x120] sm:$0xff] %v3675_v50  ;;  %v1958_v56 = vadd.f32 %v1957_v33, %v1764_v32  ;;  %v1768_v57 = vpop.f32.mrf.mxu0 }
 0x194   : > { %v1961_v0 = vpop.f32.mrf.mxu1 }
 0x195   : > { %v3677_v3 = vpack.c.bf16 %v1958_v56, %v1956_v52  ;;  %v1770_v6 = vpop.f32.mrf.mxu0  ;;  %v1962_v15 = vadd.f32 %v1961_v0, %v1768_v57 }
 0x196   : > { %v1963_v7 = vpop.f32.mrf.mxu1 }
 0x197   : > { %3215 = vst [vmem:[%s4722_s19 + $0x130] sm:$0xff] %v3677_v3  ;;  %v1964_v34 = vadd.f32 %v1963_v7, %v1770_v6  ;;  %v1772_v20 = vpop.f32.mrf.mxu0 }
 0x198   : > { %v1965_v35 = vpop.f32.mrf.mxu1 }
 0x199   : > { %v3679_v22 = vpack.c.bf16 %v1964_v34, %v1962_v15  ;;  %v1774_v44 = vpop.f32.mrf.mxu0  ;;  %v1966_v24 = vadd.f32 %v1965_v35, %v1772_v20 }
 0x19a   : > { %v1967_v45 = vpop.f32.mrf.mxu1 }
 0x19b   : > { %3217 = vst [vmem:[%s4722_s19 + $0x140] sm:$0xff] %v3679_v22  ;;  %v1968_v36 = vadd.f32 %v1967_v45, %v1774_v44  ;;  %v1778_v37 = vpop.f32.mrf.mxu0 }
 0x19c   : > { %v1971_v39 = vpop.f32.mrf.mxu1 }
 0x19d   : > { %v3681_v40 = vpack.c.bf16 %v1968_v36, %v1966_v24  ;;  %v1780_v48 = vpop.f32.mrf.mxu0  ;;  %v1972_v60 = vadd.f32 %v1971_v39, %v1778_v37 }
 0x19e   : > { %v1973_v53 = vpop.f32.mrf.mxu1 }
 0x19f   : > { %3219 = vst [vmem:[%s4722_s19 + $0x150] sm:$0xff] %v3681_v40  ;;  %v1974_v46 = vadd.f32 %v1973_v53, %v1780_v48  ;;  %v1782_v61 = vpop.f32.mrf.mxu0 }
 0x1a0   : > { %v1975_v47 = vpop.f32.mrf.mxu1 }
 0x1a1   : > { %v3683_v62 = vpack.c.bf16 %v1974_v46, %v1972_v60  ;;  %v1784_v54 = vpop.f32.mrf.mxu0  ;;  %v1976_v63 = vadd.f32 %v1975_v47, %v1782_v61 }
 0x1a2   : > { %v1977_v55 = vpop.f32.mrf.mxu1 }
 0x1a3   : > { %3221 = vst [vmem:[%s4722_s19 + $0x160] sm:$0xff] %v3683_v62  ;;  %v1978_v1 = vadd.f32 %v1977_v55, %v1784_v54  ;;  %v1788_v2 = vpop.f32.mrf.mxu0 }
 0x1a4   : > { %v1981_v10 = vpop.f32.mrf.mxu1 }
 0x1a5   : > { %v3685_v11 = vpack.c.bf16 %v1978_v1, %v1976_v63  ;;  %v1790_v12 = vpop.f32.mrf.mxu0  ;;  %v1982_v49 = vadd.f32 %v1981_v10, %v1788_v2 }
 0x1a6   : > { %v1983_v13 = vpop.f32.mrf.mxu1 }
 0x1a7   : > { %3223 = vst [vmem:[%s4722_s19 + $0x170] sm:$0xff] %v3685_v11  ;;  %v1984_v51 = vadd.f32 %v1983_v13, %v1790_v12  ;;  %v1792_v4 = vpop.f32.mrf.mxu0 }
 0x1a8   : > { %v1985_v5 = vpop.f32.mrf.mxu1 }
 0x1a9   : > { %v3687_v58 = vpack.c.bf16 %v1984_v51, %v1982_v49  ;;  %v1794_v8 = vpop.f32.mrf.mxu0  ;;  %v1986_v9 = vadd.f32 %v1985_v5, %v1792_v4 }
 0x1aa   : > { %v1987_v59 = vpop.f32.mrf.mxu1 }
 0x1ab   : > { %3225 = vst [vmem:[%s4722_s19 + $0x180] sm:$0xff] %v3687_v58  ;;  %v1988_v16 = vadd.f32 %v1987_v59, %v1794_v8  ;;  %v1798_v14 = vpop.f32.mrf.mxu0 }
 0x1ac   : > { %v1991_v17 = vpop.f32.mrf.mxu1 }
 0x1ad   : > { %v3689_v21 = vpack.c.bf16 %v1988_v16, %v1986_v9  ;;  %v1800_v18 = vpop.f32.mrf.mxu0  ;;  %v1992_v27 = vadd.f32 %v1991_v17, %v1798_v14 }
 0x1ae   : > { %v1993_v23 = vpop.f32.mrf.mxu1 }
 0x1af   : > { %3227 = vst [vmem:[%s4722_s19 + $0x190] sm:$0xff] %v3689_v21  ;;  %v1994_v19 = vadd.f32 %v1993_v23, %v1800_v18  ;;  %v1802_v25 = vpop.f32.mrf.mxu0 }
 0x1b0   : > { %v1995_v26 = vpop.f32.mrf.mxu1 }
 0x1b1   : > { %v3691_v30 = vpack.c.bf16 %v1994_v19, %v1992_v27  ;;  %v1804_v31 = vpop.f32.mrf.mxu0  ;;  %v1996_v41 = vadd.f32 %v1995_v26, %v1802_v25 }
 0x1b2   : > { %v1997_v38 = vpop.f32.mrf.mxu1 }
 0x1b3   : > { %3229 = vst [vmem:[%s4722_s19 + $0x1a0] sm:$0xff] %v3691_v30  ;;  %v1998_v42 = vadd.f32 %v1997_v38, %v1804_v31  ;;  %v1808_v28 = vpop.f32.mrf.mxu0 }
 0x1b4   : > { %v2001_v43 = vpop.f32.mrf.mxu1 }
 0x1b5   : > { %v3693_v29 = vpack.c.bf16 %v1998_v42, %v1996_v41  ;;  %v1810_v50 = vpop.f32.mrf.mxu0  ;;  %v2002_v33 = vadd.f32 %v2001_v43, %v1808_v28 }
 0x1b6   : > { %v2003_v32 = vpop.f32.mrf.mxu1 }
 0x1b7   : > { %3231 = vst [vmem:[%s4722_s19 + $0x1b0] sm:$0xff] %v3693_v29  ;;  %v2004_v52 = vadd.f32 %v2003_v32, %v1810_v50  ;;  %v1812_v56 = vpop.f32.mrf.mxu0 }
 0x1b8   : > { %v2005_v57 = vpop.f32.mrf.mxu1 }
 0x1b9   : > { %v3695_v0 = vpack.c.bf16 %v2004_v52, %v2002_v33  ;;  %v1814_v3 = vpop.f32.mrf.mxu0  ;;  %v2006_v7 = vadd.f32 %v2005_v57, %v1812_v56 }
 0x1ba   : > { %v2007_v6 = vpop.f32.mrf.mxu1 }
 0x1bb   : > { %3233 = vst [vmem:[%s4722_s19 + $0x1c0] sm:$0xff] %v3695_v0  ;;  %v2008_v15 = vadd.f32 %v2007_v6, %v1814_v3  ;;  %v1818_v34 = vpop.f32.mrf.mxu0 }
 0x1bc   : > { %v2011_v20 = vpop.f32.mrf.mxu1 }
 0x1bd   : > { %v3697_v35 = vpack.c.bf16 %v2008_v15, %v2006_v7  ;;  %v1820_v22 = vpop.f32.mrf.mxu0  ;;  %v2012_v45 = vadd.f32 %v2011_v20, %v1818_v34 }
 0x1be   : > { %v2013_v44 = vpop.f32.mrf.mxu1 }
 0x1bf   : > { %3235 = vst [vmem:[%s4722_s19 + $0x1d0] sm:$0xff] %v3697_v35  ;;  %v2014_v24 = vadd.f32 %v2013_v44, %v1820_v22  ;;  %v1822_v36 = vpop.f32.mrf.mxu0 }
 0x1c0   : > { %v2015_v37 = vpop.f32.mrf.mxu1 }
 0x1c1   : > { %v3699_v39 = vpack.c.bf16 %v2014_v24, %v2012_v45  ;;  %v1824_v40 = vpop.f32.mrf.mxu0  ;;  %v2016_v53 = vadd.f32 %v2015_v37, %v1822_v36 }
 0x1c2   : > { %v2017_v48 = vpop.f32.mrf.mxu1 }
 0x1c3   : > { %3237 = vst [vmem:[%s4722_s19 + $0x1e0] sm:$0xff] %v3699_v39  ;;  %v2018_v60 = vadd.f32 %v2017_v48, %v1824_v40  ;;  %v2054_v46 = vpop.f32.mrf.mxu0 }
 0x1c4   : > { %v2247_v61 = vpop.f32.mrf.mxu1 }
 0x1c5   : > { %v3701_v47 = vpack.c.bf16 %v2018_v60, %v2016_v53  ;;  %v2056_v62 = vpop.f32.mrf.mxu0  ;;  %v2248_v55 = vadd.f32 %v2247_v61, %v2054_v46 }
 0x1c6   : > { %v2249_v54 = vpop.f32.mrf.mxu1 }
 0x1c7   : > { %3239 = vst [vmem:[%s4722_s19 + $0x1f0] sm:$0xff] %v3701_v47  ;;  %v2250_v63 = vadd.f32 %v2249_v54, %v2056_v62  ;;  %v2058_v1 = vpop.f32.mrf.mxu0 }
 0x1c8   : > { %v2251_v2 = vpop.f32.mrf.mxu1 }
 0x1c9   : > { %v3640_v10 = vpack.c.bf16 %v2250_v63, %v2248_v55  ;;  %v2060_v11 = vpop.f32.mrf.mxu0  ;;  %v2252_v13 = vadd.f32 %v2251_v2, %v2058_v1 }
 0x1ca   : > { %v2253_v12 = vpop.f32.mrf.mxu1 }
 0x1cb   : > { %3178 = vst [vmem:[%s4722_s19 + $0x8] sm:$0xff] %v3640_v10  ;;  %v2254_v49 = vadd.f32 %v2253_v12, %v2060_v11  ;;  %v2064_v51 = vpop.f32.mrf.mxu0 }
 0x1cc   : > { %v2257_v4 = vpop.f32.mrf.mxu1 }
 0x1cd   : > { %v3642_v5 = vpack.c.bf16 %v2254_v49, %v2252_v13  ;;  %v2066_v58 = vpop.f32.mrf.mxu0  ;;  %v2258_v59 = vadd.f32 %v2257_v4, %v2064_v51 }
 0x1ce   : > { %v2259_v8 = vpop.f32.mrf.mxu1 }
 0x1cf   : > { %3180 = vst [vmem:[%s4722_s19 + $0x18] sm:$0xff] %v3642_v5  ;;  %v2260_v9 = vadd.f32 %v2259_v8, %v2066_v58  ;;  %v2068_v16 = vpop.f32.mrf.mxu0 }
 0x1d0   : > { %v2261_v14 = vpop.f32.mrf.mxu1 }
 0x1d1   : > { %v3644_v17 = vpack.c.bf16 %v2260_v9, %v2258_v59  ;;  %v2070_v21 = vpop.f32.mrf.mxu0  ;;  %v2262_v23 = vadd.f32 %v2261_v14, %v2068_v16 }
 0x1d2   : > { %v2263_v18 = vpop.f32.mrf.mxu1 }
 0x1d3   : > { %3182 = vst [vmem:[%s4722_s19 + $0x28] sm:$0xff] %v3644_v17  ;;  %v2264_v27 = vadd.f32 %v2263_v18, %v2070_v21  ;;  %v2074_v19 = vpop.f32.mrf.mxu0 }
 0x1d4   : > { %v2267_v25 = vpop.f32.mrf.mxu1 }
 0x1d5   : > { %v3646_v26 = vpack.c.bf16 %v2264_v27, %v2262_v23  ;;  %v2076_v30 = vpop.f32.mrf.mxu0  ;;  %v2268_v38 = vadd.f32 %v2267_v25, %v2074_v19 }
 0x1d6   : > { %v2269_v31 = vpop.f32.mrf.mxu1 }
 0x1d7   : > { %3184 = vst [vmem:[%s4722_s19 + $0x38] sm:$0xff] %v3646_v26  ;;  %v2270_v41 = vadd.f32 %v2269_v31, %v2076_v30  ;;  %v2078_v42 = vpop.f32.mrf.mxu0 }
 0x1d8   : > { %v2271_v28 = vpop.f32.mrf.mxu1 }
 0x1d9   : > { %v3648_v43 = vpack.c.bf16 %v2270_v41, %v2268_v38  ;;  %v2080_v29 = vpop.f32.mrf.mxu0  ;;  %v2272_v32 = vadd.f32 %v2271_v28, %v2078_v42 }
 0x1da   : > { %v2273_v50 = vpop.f32.mrf.mxu1 }
 0x1db   : > { %3186 = vst [vmem:[%s4722_s19 + $0x48] sm:$0xff] %v3648_v43  ;;  %v2274_v33 = vadd.f32 %v2273_v50, %v2080_v29  ;;  %v2084_v52 = vpop.f32.mrf.mxu0 }
 0x1dc   : > { %v2277_v56 = vpop.f32.mrf.mxu1 }
 0x1dd   : > { %v3650_v57 = vpack.c.bf16 %v2274_v33, %v2272_v32  ;;  %v2086_v0 = vpop.f32.mrf.mxu0  ;;  %v2278_v6 = vadd.f32 %v2277_v56, %v2084_v52 }
 0x1de   : > { %v2279_v3 = vpop.f32.mrf.mxu1 }
 0x1df   : > { %3188 = vst [vmem:[%s4722_s19 + $0x58] sm:$0xff] %v3650_v57  ;;  %v2280_v7 = vadd.f32 %v2279_v3, %v2086_v0  ;;  %v2088_v15 = vpop.f32.mrf.mxu0 }
 0x1e0   : > { %v2281_v34 = vpop.f32.mrf.mxu1 }
 0x1e1   : > { %v3652_v20 = vpack.c.bf16 %v2280_v7, %v2278_v6  ;;  %v2090_v35 = vpop.f32.mrf.mxu0  ;;  %v2282_v44 = vadd.f32 %v2281_v34, %v2088_v15 }
 0x1e2   : > { %v2283_v22 = vpop.f32.mrf.mxu1 }
 0x1e3   : > { %3190 = vst [vmem:[%s4722_s19 + $0x68] sm:$0xff] %v3652_v20  ;;  %v2284_v45 = vadd.f32 %v2283_v22, %v2090_v35  ;;  %v2094_v24 = vpop.f32.mrf.mxu0 }
 0x1e4   : > { %v2287_v36 = vpop.f32.mrf.mxu1 }
 0x1e5   : > { %v3654_v37 = vpack.c.bf16 %v2284_v45, %v2282_v44  ;;  %v2096_v39 = vpop.f32.mrf.mxu0  ;;  %v2288_v48 = vadd.f32 %v2287_v36, %v2094_v24 }
 0x1e6   : > { %v2289_v40 = vpop.f32.mrf.mxu1 }
 0x1e7   : > { %3192 = vst [vmem:[%s4722_s19 + $0x78] sm:$0xff] %v3654_v37  ;;  %v2290_v53 = vadd.f32 %v2289_v40, %v2096_v39  ;;  %v2098_v60 = vpop.f32.mrf.mxu0 }
 0x1e8   : > { %v2291_v46 = vpop.f32.mrf.mxu1 }
 0x1e9   : > { %v3656_v61 = vpack.c.bf16 %v2290_v53, %v2288_v48  ;;  %v2100_v47 = vpop.f32.mrf.mxu0  ;;  %v2292_v54 = vadd.f32 %v2291_v46, %v2098_v60 }
 0x1ea   : > { %v2293_v62 = vpop.f32.mrf.mxu1 }
 0x1eb   : > { %3194 = vst [vmem:[%s4722_s19 + $0x88] sm:$0xff] %v3656_v61  ;;  %v2294_v55 = vadd.f32 %v2293_v62, %v2100_v47  ;;  %v2104_v63 = vpop.f32.mrf.mxu0 }
 0x1ec   : > { %v2297_v1 = vpop.f32.mrf.mxu1 }
 0x1ed   : > { %v3658_v2 = vpack.c.bf16 %v2294_v55, %v2292_v54  ;;  %v2106_v10 = vpop.f32.mrf.mxu0  ;;  %v2298_v12 = vadd.f32 %v2297_v1, %v2104_v63 }
 0x1ee   : > { %v2299_v11 = vpop.f32.mrf.mxu1 }
 0x1ef   : > { %3196 = vst [vmem:[%s4722_s19 + $0x98] sm:$0xff] %v3658_v2  ;;  %v2300_v13 = vadd.f32 %v2299_v11, %v2106_v10  ;;  %v2108_v49 = vpop.f32.mrf.mxu0 }
 0x1f0   : > { %v2301_v51 = vpop.f32.mrf.mxu1 }
 0x1f1   : > { %v3660_v4 = vpack.c.bf16 %v2300_v13, %v2298_v12  ;;  %v2110_v5 = vpop.f32.mrf.mxu0  ;;  %v2302_v8 = vadd.f32 %v2301_v51, %v2108_v49 }
 0x1f2   : > { %v2303_v58 = vpop.f32.mrf.mxu1 }
 0x1f3   : > { %3198 = vst [vmem:[%s4722_s19 + $0xa8] sm:$0xff] %v3660_v4  ;;  %v2304_v59 = vadd.f32 %v2303_v58, %v2110_v5  ;;  %v2114_v9 = vpop.f32.mrf.mxu0 }
 0x1f4   : > { %v2307_v16 = vpop.f32.mrf.mxu1 }
 0x1f5   : > { %v3662_v14 = vpack.c.bf16 %v2304_v59, %v2302_v8  ;;  %v2116_v17 = vpop.f32.mrf.mxu0  ;;  %v2308_v18 = vadd.f32 %v2307_v16, %v2114_v9 }
 0x1f6   : > { %v2309_v21 = vpop.f32.mrf.mxu1 }
 0x1f7   : > { %3200 = vst [vmem:[%s4722_s19 + $0xb8] sm:$0xff] %v3662_v14  ;;  %v2310_v23 = vadd.f32 %v2309_v21, %v2116_v17  ;;  %v2118_v27 = vpop.f32.mrf.mxu0 }
 0x1f8   : > { %v2311_v19 = vpop.f32.mrf.mxu1 }
 0x1f9   : > { %v3664_v25 = vpack.c.bf16 %v2310_v23, %v2308_v18  ;;  %v2120_v26 = vpop.f32.mrf.mxu0  ;;  %v2312_v31 = vadd.f32 %v2311_v19, %v2118_v27 }
 0x1fa   : > { %v2313_v30 = vpop.f32.mrf.mxu1 }
 0x1fb   : > { %3202 = vst [vmem:[%s4722_s19 + $0xc8] sm:$0xff] %v3664_v25  ;;  %v2314_v38 = vadd.f32 %v2313_v30, %v2120_v26  ;;  %v2124_v41 = vpop.f32.mrf.mxu0 }
 0x1fc   : > { %v2317_v42 = vpop.f32.mrf.mxu1 }
 0x1fd   : > { %v3666_v28 = vpack.c.bf16 %v2314_v38, %v2312_v31  ;;  %v2126_v43 = vpop.f32.mrf.mxu0  ;;  %v2318_v50 = vadd.f32 %v2317_v42, %v2124_v41 }
 0x1fe   : > { %v2319_v29 = vpop.f32.mrf.mxu1 }
 0x1ff   : > { %3204 = vst [vmem:[%s4722_s19 + $0xd8] sm:$0xff] %v3666_v28  ;;  %v2320_v32 = vadd.f32 %v2319_v29, %v2126_v43  ;;  %v2128_v33 = vpop.f32.mrf.mxu0 }
 0x200   : > { %v2321_v52 = vpop.f32.mrf.mxu1 }
 0x201   : > { %v3668_v56 = vpack.c.bf16 %v2320_v32, %v2318_v50  ;;  %v2130_v57 = vpop.f32.mrf.mxu0  ;;  %v2322_v3 = vadd.f32 %v2321_v52, %v2128_v33 }
 0x202   : > { %v2323_v0 = vpop.f32.mrf.mxu1 }
 0x203   : > { %3206 = vst [vmem:[%s4722_s19 + $0xe8] sm:$0xff] %v3668_v56  ;;  %v2324_v6 = vadd.f32 %v2323_v0, %v2130_v57  ;;  %v2134_v7 = vpop.f32.mrf.mxu0 }
 0x204   : > { %v2327_v15 = vpop.f32.mrf.mxu1 }
 0x205   : > { %v3670_v34 = vpack.c.bf16 %v2324_v6, %v2322_v3  ;;  %v2136_v20 = vpop.f32.mrf.mxu0  ;;  %v2328_v22 = vadd.f32 %v2327_v15, %v2134_v7 }
 0x206   : > { %v2329_v35 = vpop.f32.mrf.mxu1 }
 0x207   : > { %3208 = vst [vmem:[%s4722_s19 + $0xf8] sm:$0xff] %v3670_v34  ;;  %v2330_v44 = vadd.f32 %v2329_v35, %v2136_v20  ;;  %v2138_v45 = vpop.f32.mrf.mxu0 }
 0x208   : > { %v2331_v24 = vpop.f32.mrf.mxu1 }
 0x209   : > { %v3672_v36 = vpack.c.bf16 %v2330_v44, %v2328_v22  ;;  %v2140_v37 = vpop.f32.mrf.mxu0  ;;  %v2332_v40 = vadd.f32 %v2331_v24, %v2138_v45 }
 0x20a   : > { %v2333_v39 = vpop.f32.mrf.mxu1 }
 0x20b   : > { %3210 = vst [vmem:[%s4722_s19 + $0x108] sm:$0xff] %v3672_v36  ;;  %v2334_v48 = vadd.f32 %v2333_v39, %v2140_v37  ;;  %v2144_v53 = vpop.f32.mrf.mxu0 }
 0x20c   : > { %v2337_v60 = vpop.f32.mrf.mxu1 }
 0x20d   : > { %v3674_v46 = vpack.c.bf16 %v2334_v48, %v2332_v40  ;;  %v2146_v61 = vpop.f32.mrf.mxu0  ;;  %v2338_v62 = vadd.f32 %v2337_v60, %v2144_v53 }
 0x20e   : > { %v2339_v47 = vpop.f32.mrf.mxu1 }
 0x20f   : > { %3212 = vst [vmem:[%s4722_s19 + $0x118] sm:$0xff] %v3674_v46  ;;  %v2340_v54 = vadd.f32 %v2339_v47, %v2146_v61  ;;  %v2148_v55 = vpop.f32.mrf.mxu0 }
 0x210   : > { %v2341_v63 = vpop.f32.mrf.mxu1 }
 0x211   : > { %v3676_v1 = vpack.c.bf16 %v2340_v54, %v2338_v62  ;;  %v2150_v2 = vpop.f32.mrf.mxu0  ;;  %v2342_v11 = vadd.f32 %v2341_v63, %v2148_v55 }
 0x212   : > { %v2343_v10 = vpop.f32.mrf.mxu1 }
 0x213   : > { %3214 = vst [vmem:[%s4722_s19 + $0x128] sm:$0xff] %v3676_v1  ;;  %v2344_v12 = vadd.f32 %v2343_v10, %v2150_v2  ;;  %v2154_v13 = vpop.f32.mrf.mxu0 }
 0x214   : > { %v2347_v49 = vpop.f32.mrf.mxu1 }
 0x215   : > { %v3678_v51 = vpack.c.bf16 %v2344_v12, %v2342_v11  ;;  %v2156_v4 = vpop.f32.mrf.mxu0  ;;  %v2348_v58 = vadd.f32 %v2347_v49, %v2154_v13 }
 0x216   : > { %v2349_v5 = vpop.f32.mrf.mxu1 }
 0x217   : > { %3216 = vst [vmem:[%s4722_s19 + $0x138] sm:$0xff] %v3678_v51  ;;  %v2350_v8 = vadd.f32 %v2349_v5, %v2156_v4  ;;  %v2158_v59 = vpop.f32.mrf.mxu0 }
 0x218   : > { %v2351_v9 = vpop.f32.mrf.mxu1 }
 0x219   : > { %v3680_v16 = vpack.c.bf16 %v2350_v8, %v2348_v58  ;;  %v2160_v14 = vpop.f32.mrf.mxu0  ;;  %v2352_v21 = vadd.f32 %v2351_v9, %v2158_v59 }
 0x21a   : > { %v2353_v17 = vpop.f32.mrf.mxu1 }
 0x21b   : > { %3218 = vst [vmem:[%s4722_s19 + $0x148] sm:$0xff] %v3680_v16  ;;  %v2354_v18 = vadd.f32 %v2353_v17, %v2160_v14  ;;  %v2164_v23 = vpop.f32.mrf.mxu0 }
 0x21c   : > { %v2357_v27 = vpop.f32.mrf.mxu1 }
 0x21d   : > { %v3682_v19 = vpack.c.bf16 %v2354_v18, %v2352_v21  ;;  %v2166_v25 = vpop.f32.mrf.mxu0  ;;  %v2358_v30 = vadd.f32 %v2357_v27, %v2164_v23 }
 0x21e   : > { %v2359_v26 = vpop.f32.mrf.mxu1 }
 0x21f   : > { %3220 = vst [vmem:[%s4722_s19 + $0x158] sm:$0xff] %v3682_v19  ;;  %v2360_v31 = vadd.f32 %v2359_v26, %v2166_v25  ;;  %v2168_v38 = vpop.f32.mrf.mxu0 }
 0x220   : > { %v2361_v41 = vpop.f32.mrf.mxu1 }
 0x221   : > { %v3684_v42 = vpack.c.bf16 %v2360_v31, %v2358_v30  ;;  %v2170_v28 = vpop.f32.mrf.mxu0  ;;  %v2362_v29 = vadd.f32 %v2361_v41, %v2168_v38 }
 0x222   : > { %v2363_v43 = vpop.f32.mrf.mxu1 }
 0x223   : > { %3222 = vst [vmem:[%s4722_s19 + $0x168] sm:$0xff] %v3684_v42  ;;  %v2364_v50 = vadd.f32 %v2363_v43, %v2170_v28  ;;  %v2174_v32 = vpop.f32.mrf.mxu0 }
 0x224   : > { %v2367_v33 = vpop.f32.mrf.mxu1 }
 0x225   : > { %v3686_v52 = vpack.c.bf16 %v2364_v50, %v2362_v29  ;;  %v2176_v56 = vpop.f32.mrf.mxu0  ;;  %v2368_v0 = vadd.f32 %v2367_v33, %v2174_v32 }
 0x226   : > { %v2369_v57 = vpop.f32.mrf.mxu1 }
 0x227   : > { %3224 = vst [vmem:[%s4722_s19 + $0x178] sm:$0xff] %v3686_v52  ;;  %v2370_v3 = vadd.f32 %v2369_v57, %v2176_v56  ;;  %v2178_v6 = vpop.f32.mrf.mxu0 }
 0x228   : > { %v2371_v7 = vpop.f32.mrf.mxu1 }
 0x229   : > { %v3688_v15 = vpack.c.bf16 %v2370_v3, %v2368_v0  ;;  %v2180_v34 = vpop.f32.mrf.mxu0  ;;  %v2372_v35 = vadd.f32 %v2371_v7, %v2178_v6 }
 0x22a   : > { %v2373_v20 = vpop.f32.mrf.mxu1 }
 0x22b   : > { %3226 = vst [vmem:[%s4722_s19 + $0x188] sm:$0xff] %v3688_v15  ;;  %v2374_v22 = vadd.f32 %v2373_v20, %v2180_v34  ;;  %v2184_v44 = vpop.f32.mrf.mxu0 }
 0x22c   : > { %v2377_v45 = vpop.f32.mrf.mxu1 }
 0x22d   : > { %v3690_v24 = vpack.c.bf16 %v2374_v22, %v2372_v35  ;;  %v2186_v36 = vpop.f32.mrf.mxu0  ;;  %v2378_v39 = vadd.f32 %v2377_v45, %v2184_v44 }
 0x22e   : > { %v2379_v37 = vpop.f32.mrf.mxu1 }
 0x22f   : > { %3228 = vst [vmem:[%s4722_s19 + $0x198] sm:$0xff] %v3690_v24  ;;  %v2380_v40 = vadd.f32 %v2379_v37, %v2186_v36  ;;  %v2188_v48 = vpop.f32.mrf.mxu0 }
 0x230   : > { %v2381_v53 = vpop.f32.mrf.mxu1 }
 0x231   : > { %v3692_v60 = vpack.c.bf16 %v2380_v40, %v2378_v39  ;;  %v2190_v46 = vpop.f32.mrf.mxu0  ;;  %v2382_v47 = vadd.f32 %v2381_v53, %v2188_v48 }
 0x232   : > { %v2383_v61 = vpop.f32.mrf.mxu1 }
 0x233   : > { %3230 = vst [vmem:[%s4722_s19 + $0x1a8] sm:$0xff] %v3692_v60  ;;  %v2384_v62 = vadd.f32 %v2383_v61, %v2190_v46  ;;  %v2194_v54 = vpop.f32.mrf.mxu0 }
 0x234   : > { %v2387_v55 = vpop.f32.mrf.mxu1 }
 0x235   : > { %v3694_v63 = vpack.c.bf16 %v2384_v62, %v2382_v47  ;;  %v2196_v1 = vpop.f32.mrf.mxu0  ;;  %v2388_v10 = vadd.f32 %v2387_v55, %v2194_v54 }
 0x236   : > { %v2389_v2 = vpop.f32.mrf.mxu1 }
 0x237   : > { %3232 = vst [vmem:[%s4722_s19 + $0x1b8] sm:$0xff] %v3694_v63  ;;  %v2390_v11 = vadd.f32 %v2389_v2, %v2196_v1  ;;  %v2198_v12 = vpop.f32.mrf.mxu0 }
 0x238   : > { %v2391_v13 = vpop.f32.mrf.mxu1 }
 0x239   : > { %v3696_v49 = vpack.c.bf16 %v2390_v11, %v2388_v10  ;;  %v2200_v51 = vpop.f32.mrf.mxu0  ;;  %v2392_v5 = vadd.f32 %v2391_v13, %v2198_v12 }
 0x23a   : > { %v2393_v4 = vpop.f32.mrf.mxu1 }
 0x23b   : > { %3234 = vst [vmem:[%s4722_s19 + $0x1c8] sm:$0xff] %v3696_v49  ;;  %v2394_v58 = vadd.f32 %v2393_v4, %v2200_v51  ;;  %v2204_v8 = vpop.f32.mrf.mxu0 }
 0x23c   : > { %v2397_v59 = vpop.f32.mrf.mxu1 }
 0x23d   : > { %v3698_v9 = vpack.c.bf16 %v2394_v58, %v2392_v5  ;;  %v2206_v16 = vpop.f32.mrf.mxu0  ;;  %v2398_v17 = vadd.f32 %v2397_v59, %v2204_v8 }
 0x23e   : > { %v2399_v14 = vpop.f32.mrf.mxu1 }
 0x23f   : > { %3236 = vst [vmem:[%s4722_s19 + $0x1d8] sm:$0xff] %v3698_v9  ;;  %v2400_v21 = vadd.f32 %v2399_v14, %v2206_v16  ;;  %v2208_v18 = vpop.f32.mrf.mxu0 }
 0x240   : > { %v2401_v23 = vpop.f32.mrf.mxu1 }
 0x241   : > { %v3700_v27 = vpack.c.bf16 %v2400_v21, %v2398_v17  ;;  %v2210_v19 = vpop.f32.mrf.mxu0  ;;  %v2402_v26 = vadd.f32 %v2401_v23, %v2208_v18 }
 0x242   : > { %v2403_v25 = vpop.f32.mrf.mxu1 }
 0x243   : > { %3238 = vst [vmem:[%s4722_s19 + $0x1e8] sm:$0xff] %v3700_v27  ;;  %v2404_v30 = vadd.f32 %v2403_v25, %v2210_v19 }
 0x245   : > { %v3702_v31 = vpack.c.bf16 %v2404_v30, %v2402_v26 }
 0x247   : > { %3240 = vst [vmem:[%s4722_s19 + $0x1f8] sm:$0xff] %v3702_v31 }
 0x248   : > { %4138 = shalt.err (!%p4135_p0)
}
 0x249   : > { %s4139_s4 = scalar_lea.hbm %s4818_s23, 8192  ;;  %s4143_s5 = scalar_lea.hbm %s4871_s2, 16384 }
 0x24a   : > { %p4140_p1 = scmp.ne.s32.totalorder %s4818_s23, %s4139_s4  ;;  %p4144_p9 = scmp.lt.s32.totalorder %s4818_s23, %s4871_s2 }
 0x24b   : > { %p4145_p11 = scmp.lt.s32.totalorder %s4143_s5, %s4139_s4 }
 0x24c   : > { %p4141_p5 = pnand %p4140_p1, %p4888_p12 }
 0x24d   : > { %p4146_p2 = por %p4145_p11, %p4144_p9 }
 0x24e   : > { %p4142_p7 = pneg %p4141_p5 }
 0x250   : > { %p4147_p3 = pnand %p4146_p2, %p4142_p7 }
 0x252   : > { %4150 = shalt.err (!%p4147_p3)
}
 0x253   : > { %s4217_s15 = smov 256   ;;  %s4218_s17 = smov 512  }
 0x254   : > { %s4219_s19 = smov 16  }
 0x255   : > { %3710 = dma.vmem_to_hbm [thread:$0]  (%p4888_p12), %s4820_s30, 8192, %s4818_s23, %s3242_s12, %s4217_s15, %s4218_s17, %s4219_s19  }
 0x256 PF: > { %s4889_s22 = sld [smem:[#allocation12_spill]]  ;;  %s3273_s16 = sand.u32 1, %s4189_s9  }
 0x257   : > { %p4890_p13 = scmp.ne.s32.totalorder %s4882_s21, 0  ;;  %s3274_s18 = scalar_lea.sflag [#allocation5], %s3273_s16 }
 0x25c   : > { %p4891_p4 = scmp.ge.s32.totalorder %s4889_s22, 2 }
 0x25e   : > { %p3721_p6 = pnand %p4891_p4, %p4890_p13 }
 0x260   : > { %p3722_p8 = pneg %p3721_p6 }
 0x262   : > { %4184 = dma.done.wait (%p3722_p8), %s3274_s18, 8192  }
 0x263   : > { %4186 = vsyncadd (%p3722_p8), %s3274_s18, 4294959104  ;;  %s19_s25 = sadd.s32 1, %s4889_s22   ;;  %s4892_s9 = smov %s4193_s10 }
 0x264   : > { %p16_p10 = scmp.ge.s32.totalorder %s19_s25, 4   ;;  %s4893_s10 = smov %s4197_s11 }
 0x265   : > { %s4894_s11 = smov %s4338_s14  ;;  %s4895_s12 = smov %s4205_s13 }
 0x266   : > { %s4896_s13 = smov %s4899_s27  ;;  %s4897_s14 = smov %s19_s25 }
 0x267   :  { %18 = sbr.rel (!%p16_p10) target bundleno = 7 (0x7), region = 87 }
 0x26c   :  { %3279 = vsyncpa [#allocation4], 1 }
 0x26d   :  { %3281 = vsyncpa [#allocation4 + $0x1], 1 }
 0x26e   :  { %3282 = vsyncpa [#allocation7], 1 }
 0x26f   :  { %3284 = vsyncpa [#allocation7 + $0x1], 1 }
 0x270   :  { %3285 = vsyncpa [#allocation5], 1 }
 0x271   :  { %3287 = vsyncpa [#allocation5 + $0x1], 1 }

</bundles_post_ra>
